<compile_context>
chip_gen: v6e
topology: v6e:2x2x1
jax: 0.10.0
libtpu: 0.0.40
codegen_flags: <defaults>
</compile_context>

<pallas_src>
import jax
import jax.numpy as jnp
from jax.experimental import pallas as pl
from jax.experimental.pallas import tpu as pltpu

# Logical (PyTorch) dims.
IN_DIM = 28 * 28    # 784  (784 % 16 == 0, so no feature padding needed)
HID_DIM = 1000
OUT_DIM = 10

# Lane-dense padded dims (multiples of 128) for the hidden / class axes.
HID_PAD = 1024      # 8 * 128
OUT_PAD = 128

NEG_INF = -1e30     # fills padded logit lanes via b2 padding (f32-only trick)


def _round_up(n, m):
    return (n + m - 1) // m * m


def _choose_tiling(B, b_tile):
    """Pick (tile, padded_batch) for the batch axis.

    - >= 2 (even) grid steps when B >= 256 so dimension_semantics=("parallel",)
      actually shards across v7x's two TensorCores (no-op on v5e/v6e).
    - 16-row tiles (bf16 sublane pack) to avoid half-packed layouts.
    - Equal-sized tiles so awkward batch sizes pad by < 2*16 rows instead of
      up to a whole b_tile.
    """
    n = pl.cdiv(B, b_tile)
    if B >= 256:
        n = max(n, 2)
    if n > 1 and (n % 2):
        n += 1
    tile = _round_up(pl.cdiv(B, n), 16)
    return tile, n * tile


def mlp_kernel(x_ref, w1_ref, b1_ref, w2_ref, b2_ref, o_ref):
    # In-kernel f32 -> bf16 cast of the activation tile (x is DMA'd once, f32).
    x = x_ref[...].astype(jnp.bfloat16)
    # fc1: bf16 MXU matmul with f32 accumulation, then bias.
    h = jnp.dot(x, w1_ref[...], preferred_element_type=jnp.float32)
    # Sigmoid in bf16 (EUP logistic); the value feeds a bf16 matmul anyway.
    h = jax.nn.sigmoid((h + b1_ref[...]).astype(jnp.bfloat16))
    # fc2: padded W2 rows are zero, so sigmoid(0)=0.5 in padded hidden lanes
    # contributes nothing.
    logits = jnp.dot(h, w2_ref[...], preferred_element_type=jnp.float32)
    # b2's padded lanes hold -1e30 (f32), so padded logits drop out of the
    # max / logsumexp below.  Logits must stay f32 for this to be safe.
    logits = logits + b2_ref[...]
    # log_softmax over the lane-dense (128-wide) class axis.
    m = jnp.max(logits, axis=-1, keepdims=True)
    shifted = logits - m
    lse = jnp.log(jnp.sum(jnp.exp(shifted), axis=-1, keepdims=True))
    o_ref[...] = (shifted - lse).astype(o_ref.dtype)


def pad_params(w1, b1, w2, b2):
    """Pad params to lane-dense shapes; weights -> bf16.

    w1: (784, 1000), b1: (1, 1000), w2: (1000, 10), b2: (1, 10); all f32,
    already transposed vs. torch.nn.Linear storage (i.e. y = x @ W + b).
    """
    w1p = (jnp.zeros((IN_DIM, HID_PAD), jnp.float32)
           .at[:, :HID_DIM].set(w1)).astype(jnp.bfloat16)
    b1p = jnp.zeros((1, HID_PAD), jnp.float32).at[:, :HID_DIM].set(b1)
    w2p = (jnp.zeros((HID_PAD, OUT_PAD), jnp.float32)
           .at[:HID_DIM, :OUT_DIM].set(w2)).astype(jnp.bfloat16)
    # Padded class lanes get -1e30 so they are masked out of the softmax.
    b2p = jnp.full((1, OUT_PAD), NEG_INF, jnp.float32).at[:, :OUT_DIM].set(b2)
    return w1p, b1p, w2p, b2p


def mynet_forward(x, w1p, b1p, w2p, b2p, *, b_tile=1024):
    """x: (B, 784) float32; padded params from pad_params(). Returns (B, 10) f32.

    b_tile: max batch tile.  VMEM at tile=1024: x f32 3.1 MiB + out f32 0.5 MiB,
    both double-buffered, + ~1.9 MiB single-buffered weights ~= 9.2 MiB, under
    v5e's 16 MiB default scoped VMEM (v6e/v7x default is 32 MiB).  Raise to
    2048 on v6e/v7x for very large batches if desired.
    """
    B = x.shape[0]
    tile, Bp = _choose_tiling(B, b_tile)
    grid = (Bp // tile,)

    # Only the batch axis needs padding; no feature-axis copy, no wrapper cast.
    xp = x if Bp == B else jnp.pad(x, ((0, Bp - B), (0, 0)))

    cost = pl.CostEstimate(
        flops=2 * Bp * (IN_DIM * HID_PAD + HID_PAD * OUT_PAD),
        transcendentals=Bp * (HID_PAD + OUT_PAD),
        bytes_accessed=(xp.size * xp.dtype.itemsize      # x (f32, read once)
                        + Bp * OUT_PAD * 4               # output (f32)
                        + w1p.size * 2 + w2p.size * 2    # bf16 weights
                        + b1p.size * 4 + b2p.size * 4),  # f32 biases
    )

    out = pl.pallas_call(
        mlp_kernel,
        out_shape=jax.ShapeDtypeStruct((Bp, OUT_PAD), jnp.float32),
        grid_spec=pltpu.PrefetchScalarGridSpec(
            num_scalar_prefetch=0,
            grid=grid,
            in_specs=[
                # x tile: last dim 784 equals the full array dim (legal block).
                pl.BlockSpec((tile, IN_DIM), lambda i: (i, 0)),
                # Weights / biases: constant index_map + single buffer
                # (VMEM-resident across all grid steps).
                pl.BlockSpec((IN_DIM, HID_PAD), lambda i: (0, 0),
                             pipeline_mode=pl.Buffered(1)),
                pl.BlockSpec((1, HID_PAD), lambda i: (0, 0),
                             pipeline_mode=pl.Buffered(1)),
                pl.BlockSpec((HID_PAD, OUT_PAD), lambda i: (0, 0),
                             pipeline_mode=pl.Buffered(1)),
                pl.BlockSpec((1, OUT_PAD), lambda i: (0, 0),
                             pipeline_mode=pl.Buffered(1)),
            ],
            out_specs=pl.BlockSpec((tile, OUT_PAD), lambda i: (i, 0)),
        ),
        compiler_params=pltpu.CompilerParams(
            # Batch axis is independent -> megacore sharding on v7x.
            dimension_semantics=("parallel",),
        ),
        cost_estimate=cost,
    )(xp, w1p, b1p, w2p, b2p)

    return out[:B, :OUT_DIM]


def init_params(key):
    """Deterministic init mimicking torch.nn.Linear (uniform +-1/sqrt(fan_in))."""
    k1, k2, k3, k4 = jax.random.split(key, 4)
    bound1 = 1.0 / (IN_DIM ** 0.5)
    bound2 = 1.0 / (HID_DIM ** 0.5)
    w1 = jax.random.uniform(k1, (IN_DIM, HID_DIM), jnp.float32, -bound1, bound1)
    b1 = jax.random.uniform(k2, (1, HID_DIM), jnp.float32, -bound1, bound1)
    w2 = jax.random.uniform(k3, (HID_DIM, OUT_DIM), jnp.float32, -bound2, bound2)
    b2 = jax.random.uniform(k4, (1, OUT_DIM), jnp.float32, -bound2, bound2)
    return w1, b1, w2, b2


if __name__ == "__main__":
    key = jax.random.PRNGKey(0)
    kx, kp = jax.random.split(key)

    batch = 8
    x = jax.random.normal(kx, (batch, IN_DIM), jnp.float32)
    w1, b1, w2, b2 = init_params(kp)
    w1p, b1p, w2p, b2p = pad_params(w1, b1, w2, b2)

    out = mynet_forward(x, w1p, b1p, w2p, b2p)
    out = jax.block_until_ready(out)
    assert out.shape == (batch, OUT_DIM)
    assert bool(jnp.all(jnp.isfinite(out)))

    # Reference 1: same bf16 math (bf16 matmul inputs, f32 accum, bf16 sigmoid)
    # in pure JAX — moderately tight tolerance.
    pre = jnp.dot(x.astype(jnp.bfloat16), w1.astype(jnp.bfloat16),
                  preferred_element_type=jnp.float32) + b1
    h_b = jax.nn.sigmoid(pre.astype(jnp.bfloat16))
    logits_b = jnp.dot(h_b.astype(jnp.bfloat16), w2.astype(jnp.bfloat16),
                       preferred_element_type=jnp.float32) + b2
    ref_bf16 = jax.nn.log_softmax(logits_b, axis=1)
    assert jnp.allclose(out, ref_bf16, atol=2e-2, rtol=1e-2), \
        "mismatch vs bf16-emulated reference"

    # Reference 2: full-f32 PyTorch-equivalent forward (loose tol for bf16 path).
    h_ref = jax.nn.sigmoid(x @ w1 + b1)
    ref_f32 = jax.nn.log_softmax(h_ref @ w2 + b2, axis=1)
    assert jnp.allclose(out, ref_f32, atol=5e-2, rtol=1e-2), \
        "mismatch vs f32 reference"

    print("KERNEL_OK")
</pallas_src>

<mosaic_0001>
module attributes {stable_mosaic.version = 11 : i64} {
  func.func @mlp_kernel(%arg0: i32, %arg1: memref<16x784xf32, #tpu.memory_space<vmem>>, %arg2: memref<784x1024xbf16, #tpu.memory_space<vmem>>, %arg3: memref<1x1024xf32, #tpu.memory_space<vmem>>, %arg4: memref<1024x128xbf16, #tpu.memory_space<vmem>>, %arg5: memref<1x128xf32, #tpu.memory_space<vmem>>, %arg6: memref<16x128xf32, #tpu.memory_space<vmem>>) attributes {dimension_semantics = [#tpu.dimension_semantics<parallel>], iteration_bounds = array<i64: 1>, scalar_prefetch = 0 : i64, scratch_operands = 0 : i64, tpu.core_type = #tpu.core_type<tc>, window_params = [{transform_indices = @transform_0, window_bounds = array<i64: 16, 784>}, {pipeline_mode = #tpu.pipeline_mode<synchronous>, transform_indices = @transform_1, window_bounds = array<i64: 784, 1024>}, {pipeline_mode = #tpu.pipeline_mode<synchronous>, transform_indices = @transform_2, window_bounds = array<i64: 1, 1024>}, {pipeline_mode = #tpu.pipeline_mode<synchronous>, transform_indices = @transform_3, window_bounds = array<i64: 1024, 128>}, {pipeline_mode = #tpu.pipeline_mode<synchronous>, transform_indices = @transform_4, window_bounds = array<i64: 1, 128>}, {transform_indices = @transform_5, window_bounds = array<i64: 16, 128>}]} {
    %c0 = arith.constant 0 : index
    %c0_0 = arith.constant 0 : index
    %0 = vector.load %arg1[%c0, %c0_0] : memref<16x784xf32, #tpu.memory_space<vmem>>, vector<16x784xf32>
    %1 = arith.truncf %0 : vector<16x784xf32> to vector<16x784xbf16>
    %c0_1 = arith.constant 0 : index
    %c0_2 = arith.constant 0 : index
    %2 = vector.load %arg2[%c0_1, %c0_2] : memref<784x1024xbf16, #tpu.memory_space<vmem>>, vector<784x1024xbf16>
    %cst = arith.constant dense<0.000000e+00> : vector<16x1024xf32>
    %3 = tpu.matmul %1, %2, %cst {dimension_numbers = #tpu.dot_dimension_numbers<[1], [0], [0], [1], [0, 0, 1, 1], [], []>} : vector<16x784xbf16>, vector<784x1024xbf16>, vector<16x1024xf32> -> vector<16x1024xf32>
    %c0_3 = arith.constant 0 : index
    %c0_4 = arith.constant 0 : index
    %4 = vector.load %arg3[%c0_3, %c0_4] : memref<1x1024xf32, #tpu.memory_space<vmem>>, vector<1x1024xf32>
    %5 = vector.broadcast %4 : vector<1x1024xf32> to vector<16x1024xf32>
    %6 = arith.addf %3, %5 : vector<16x1024xf32>
    %7 = arith.truncf %6 : vector<16x1024xf32> to vector<16x1024xbf16>
    %8 = arith.negf %7 : vector<16x1024xbf16>
    %9 = math.exp %8 : vector<16x1024xbf16>
    %cst_5 = arith.constant 1.000000e+00 : bf16
    %10 = vector.broadcast %cst_5 : bf16 to vector<16x1024xbf16>
    %11 = arith.addf %10, %9 : vector<16x1024xbf16>
    %12 = arith.divf %10, %11 : vector<16x1024xbf16>
    %c0_6 = arith.constant 0 : index
    %c0_7 = arith.constant 0 : index
    %13 = vector.load %arg4[%c0_6, %c0_7] : memref<1024x128xbf16, #tpu.memory_space<vmem>>, vector<1024x128xbf16>
    %cst_8 = arith.constant dense<0.000000e+00> : vector<16x128xf32>
    %14 = tpu.matmul %12, %13, %cst_8 {dimension_numbers = #tpu.dot_dimension_numbers<[1], [0], [0], [1], [0, 0, 1, 1], [], []>} : vector<16x1024xbf16>, vector<1024x128xbf16>, vector<16x128xf32> -> vector<16x128xf32>
    %c0_9 = arith.constant 0 : index
    %c0_10 = arith.constant 0 : index
    %15 = vector.load %arg5[%c0_9, %c0_10] : memref<1x128xf32, #tpu.memory_space<vmem>>, vector<1x128xf32>
    %16 = vector.broadcast %15 : vector<1x128xf32> to vector<16x128xf32>
    %17 = arith.addf %14, %16 : vector<16x128xf32>
    %cst_11 = arith.constant dense<0xFF800000> : vector<16xf32>
    %18 = vector.multi_reduction <maximumf>, %17, %cst_11 [1] : vector<16x128xf32> to vector<16xf32>
    %19 = vector.shape_cast %18 : vector<16xf32> to vector<16x1xf32>
    %20 = vector.broadcast %19 : vector<16x1xf32> to vector<16x128xf32>
    %21 = arith.subf %17, %20 : vector<16x128xf32>
    %22 = math.exp %21 : vector<16x128xf32>
    %cst_12 = arith.constant dense<0.000000e+00> : vector<16xf32>
    %23 = vector.multi_reduction <add>, %22, %cst_12 [1] : vector<16x128xf32> to vector<16xf32>
    %24 = vector.shape_cast %23 : vector<16xf32> to vector<16x1xf32>
    %25 = math.log %24 : vector<16x1xf32>
    %26 = vector.broadcast %25 : vector<16x1xf32> to vector<16x128xf32>
    %27 = arith.subf %21, %26 : vector<16x128xf32>
    %c0_13 = arith.constant 0 : index
    %c0_14 = arith.constant 0 : index
    %28 = vector.load %arg6[%c0_13, %c0_14] : memref<16x128xf32, #tpu.memory_space<vmem>>, vector<16x128xf32>
    tpu.vector_store %arg6[%c0_13, %c0_14], %27 {strides = array<i32>} : memref<16x128xf32, #tpu.memory_space<vmem>>, vector<16x128xf32>,
    return
  }
  func.func @transform_0(%arg0: i32) -> (i32, i32) {
    %c0_i32 = arith.constant 0 : i32
    %c0_i32_0 = arith.constant 0 : i32
    return %arg0, %c0_i32 : i32, i32
  }
  func.func @transform_1(%arg0: i32) -> (i32, i32) {
    %c0_i32 = arith.constant 0 : i32
    %c0_i32_0 = arith.constant 0 : i32
    %c0_i32_1 = arith.constant 0 : i32
    return %c0_i32, %c0_i32_0 : i32, i32
  }
  func.func @transform_2(%arg0: i32) -> (i32, i32) {
    %c0_i32 = arith.constant 0 : i32
    %c0_i32_0 = arith.constant 0 : i32
    %c0_i32_1 = arith.constant 0 : i32
    return %c0_i32, %c0_i32_0 : i32, i32
  }
  func.func @transform_3(%arg0: i32) -> (i32, i32) {
    %c0_i32 = arith.constant 0 : i32
    %c0_i32_0 = arith.constant 0 : i32
    %c0_i32_1 = arith.constant 0 : i32
    return %c0_i32, %c0_i32_0 : i32, i32
  }
  func.func @transform_4(%arg0: i32) -> (i32, i32) {
    %c0_i32 = arith.constant 0 : i32
    %c0_i32_0 = arith.constant 0 : i32
    %c0_i32_1 = arith.constant 0 : i32
    return %c0_i32, %c0_i32_0 : i32, i32
  }
  func.func @transform_5(%arg0: i32) -> (i32, i32) {
    %c0_i32 = arith.constant 0 : i32
    %c0_i32_0 = arith.constant 0 : i32
    return %arg0, %c0_i32 : i32, i32
  }
}

</mosaic_0001>

<bundles_post_ra>
// kernel: tpu_custom_call.1
= control target key start
LH: loop header
LB: loop body
LE: loop exit
PB: predicated region body
PF: predicated region fallthrough
CT: control target
= control target key end

     0   :  { %10 = vsyncpa [#allocation3], 0  ;;  %s4949_s0 = inlined_call_operand.hbm [shape: f32[16,784], index: 0, kind: input, shape index: {}]   ;;  %s4950_s1 = inlined_call_operand.hbm [shape: bf16[784,1024], index: 1, kind: input, shape index: {}]   ;;  %s4951_s2 = inlined_call_operand.hbm [shape: f32[1,1024], index: 2, kind: input, shape index: {}]   ;;  %s4952_s3 = inlined_call_operand.hbm [shape: bf16[1024,128], index: 3, kind: input, shape index: {}]   ;;  %s4953_s4 = inlined_call_operand.hbm [shape: f32[1,128], index: 4, kind: input, shape index: {}]   ;;  %s4954_s5 = inlined_call_operand.hbm [shape: f32[16,128], index: 5, kind: output, shape index: {}]  }
   0x1   :  { %11 = vsyncpa [#allocation6], 0 }
   0x2   :  { %12 = vsyncpa [#allocation9], 0 }
   0x3   :  { %13 = vsyncpa [#allocation4], 0  ;;  %s4786_s18 = smov [#allocation5]  }
   0x4   :  { %s31_s19 = sshll.u32 %s4786_s18, 4  ;;  %s32_s19 = int_to_ptr.vmem [resolvable:$true] %s31_s19 }
   0x5   :  { %s4666_s20 = scalar_lea.vmem %s32_s19, 50176  ;;  %p4671_p1 = scmp.lt.s32.totalorder %s32_s19, %s32_s19 }
   0x6   :  { %p4667_p0 = scmp.ne.s32.totalorder %s32_s19, %s4666_s20  ;;  %p4672_p2 = scmp.lt.s32.totalorder %s4666_s20, %s4666_s20 }
   0x8   :  { %p4673_p3 = por %p4672_p2, %p4671_p1 }
   0xa   :  { %p4674_p4 = pnand %p4673_p3, %p4667_p0 }
   0xc   :  { %4677 = shalt.err (!%p4674_p4)
}
   0xd   :  { %s4787_s21 = smov 512   ;;  %s4788_s22 = smov 32  }
   0xe   :  { %37 = dma.hbm_to_vmem [thread:$0]  %s4950_s1, 50176, %s32_s19, [#allocation6], %s4787_s21, %s4787_s21, %s4788_s22  }
   0xf   :  { %s4789_s25 = smov [#allocation8]  }
  0x10   :  { %s53_s26 = sshll.u32 %s4789_s25, 4  ;;  %s54_s26 = int_to_ptr.vmem [resolvable:$true] %s53_s26 }
  0x11   :  { %s4686_s27 = scalar_lea.vmem %s54_s26, 8192  ;;  %p4691_p6 = scmp.lt.s32.totalorder %s54_s26, %s54_s26 }
  0x12   :  { %p4687_p5 = scmp.ne.s32.totalorder %s54_s26, %s4686_s27  ;;  %p4692_p7 = scmp.lt.s32.totalorder %s4686_s27, %s4686_s27 }
  0x14   :  { %p4693_p8 = por %p4692_p7, %p4691_p6 }
  0x16   :  { %p4694_p9 = pnand %p4693_p8, %p4687_p5 }
  0x18   :  { %4697 = shalt.err (!%p4694_p9)
}
  0x19   :  { %s4790_s28 = smov 64   ;;  %s4791_s29 = smov 4  }
  0x1a   :  { %59 = dma.hbm_to_vmem [thread:$0]  %s4952_s3, 8192, %s54_s26, [#allocation9], %s4790_s28, %s4790_s28, %s4791_s29  }
  0x1b   :  { %s4792_s7 = smov [#allocation2]  }
  0x1c   :  { %s19_s8 = sshll.u32 %s4792_s7, 4  ;;  %s20_s8 = int_to_ptr.vmem [resolvable:$true] %s19_s8 }
  0x1d   :  { %s4706_s1 = scalar_lea.vmem %s20_s8, 1792  ;;  %p4711_p11 = scmp.lt.s32.totalorder %s20_s8, %s20_s8 }
  0x1e   :  { %p4707_p10 = scmp.ne.s32.totalorder %s20_s8, %s4706_s1  ;;  %p4712_p12 = scmp.lt.s32.totalorder %s4706_s1, %s4706_s1 }
  0x20   :  { %p4713_p13 = por %p4712_p12, %p4711_p11 }
  0x22   :  { %p4714_p0 = pnand %p4713_p13, %p4707_p10 }
  0x24   :  { %4717 = shalt.err (!%p4714_p0)
}
  0x25   :  { %s4793_s9 = smov 896   ;;  %s4794_s10 = smov 56  }
  0x26   :  { %25 = dma.hbm_to_vmem [thread:$0]  %s4949_s0, 1792, %s20_s8, [#allocation3], %s4793_s9, %s4793_s9, %s4794_s10  }
  0x27   :  { %s4795_s13 = smov [#allocation7]   ;;  %s4796_s3 = smov [#allocation10]  }
  0x28   :  { %s44_s14 = sshll.u32 %s4795_s13, 4  ;;  %s66_s15 = sshll.u32 %s4796_s3, 4  ;;  %s45_s14 = int_to_ptr.vmem [resolvable:$true] %s44_s14  ;;  %s67_s15 = int_to_ptr.vmem [resolvable:$true] %s66_s15 }
  0x29   :  { %s4726_s16 = scalar_lea.vmem %s45_s14, 128  ;;  %p4731_p2 = scmp.lt.s32.totalorder %s45_s14, %s45_s14 }
  0x2a   :  { %p4727_p1 = scmp.ne.s32.totalorder %s45_s14, %s4726_s16  ;;  %p4732_p3 = scmp.lt.s32.totalorder %s4726_s16, %s4726_s16 }
  0x2c   :  { %p4733_p4 = por %p4732_p3, %p4731_p2 }
  0x2e   :  { %p4734_p5 = pnand %p4733_p4, %p4727_p1 }
  0x30   :  { %4737 = shalt.err (!%p4734_p5)
}
  0x31   :  { %47 = dma.hbm_to_vmem [thread:$0]  %s4951_s2, 128, %s45_s14, [#allocation6]  }
  0x32   :  { %s4746_s19 = scalar_lea.vmem %s67_s15, 16  ;;  %s4750_s0 = scalar_lea.vmem %s67_s15, 32 }
  0x33   :  { %p4747_p6 = scmp.ne.s32.totalorder %s67_s15, %s4746_s19  ;;  %p4751_p7 = scmp.lt.s32.totalorder %s67_s15, %s67_s15 }
  0x34   :  { %p4752_p8 = scmp.lt.s32.totalorder %s4750_s0, %s4746_s19 }
  0x36   :  { %p4753_p9 = por %p4752_p8, %p4751_p7 }
  0x38   :  { %p4754_p10 = pnand %p4753_p9, %p4747_p6 }
  0x3a   :  { %4757 = shalt.err (!%p4754_p10)
}
  0x3b   :  { %69 = dma.hbm_to_vmem [thread:$0]  %s4953_s4, 16, %s67_s15, [#allocation9]  }
  0x3c   :  { %4778 = dma.done.wait [#allocation3], 1792  }
  0x3d   :  { %4779 = vsyncadd [#allocation3], 4294965504 }
  0x3e   :  { %4780 = dma.done.wait [#allocation6], 50304  }
  0x3f   :  { %4781 = vsyncadd [#allocation6], 4294916992 }
  0x40   :  { %4782 = dma.done.wait [#allocation9], 8208  }
  0x41   :  { %4783 = vsyncadd [#allocation9], 4294959088  ;;  %v164_v0 = vld [vmem:[#allocation5 + $0x1c0] sm:$0xff]  ;;  %v88_v54 = vld [vmem:[#allocation2 + $0x8] sm:$0xff]  ;;  %vm2502_vm0 = vcmask 130048   ;;  %s4798_s2 = smov [#allocation11]  }
  0x42   :  { %v168_v1 = vld [vmem:[#allocation5 + $0x1e0] sm:$0xff]  ;;  %v95_v55 = vld [vmem:[#allocation2 + $0x40] sm:$0xff]  ;;  %v90_v59 = vld [vmem:[#allocation2 + $0x18] sm:$0xff]  ;;  %s3968_s4 = sshll.u32 %s4798_s2, 4  ;;  %s3969_s4 = int_to_ptr.vmem [resolvable:$true] %s3968_s4 }
  0x43   :  { %v292_v2 = vld [vmem:[#allocation5 + $0x5c0] sm:$0xff]  ;;  %v4039_v3 = vcombine.high %v164_v0, %v168_v1  ;;  %v4038_v5 = vcombine.low %v164_v0, %v168_v1  ;;  %v4846_v58 = vpack.c.bf16 %v95_v55, %v88_v54  ;;  %s4758_s22 = scalar_lea.vmem %s3969_s4, 256  ;;  %p4763_p12 = scmp.lt.s32.totalorder %s3969_s4, %s3969_s4 }
  0x44   :  { %v296_v4 = vld [vmem:[#allocation5 + $0x5e0] sm:$0xff]  ;;  %p4759_p11 = scmp.ne.s32.totalorder %s3969_s4, %s4758_s22  ;;  %p4764_p13 = scmp.lt.s32.totalorder %s4758_s22, %s4758_s22 }
  0x45   :  { %v156_v6 = vld [vmem:[#allocation5 + $0x180] sm:$0xff]  ;;  %v4167_v8 = vcombine.high %v292_v2, %v296_v4  ;;  %v4166_v9 = vcombine.low %v292_v2, %v296_v4  ;;  %2506 = vmatprep.subr.bf16.mxu0 %v4039_v3  ;;  %2538 = vmatprep.mubr.bf16.mxu0 %v4846_v58 }
  0x46   :  { %v160_v7 = vld [vmem:[#allocation5 + $0x1a0] sm:$0xff]  ;;  %2507 = vmatpush1.bf16.msra.mxu0 %v4038_v5  ;;  %p4765_p0 = por %p4764_p13, %p4763_p12 }
  0x47   :  { %v4031_v10 = vcombine.high %v156_v6, %v160_v7  ;;  %v284_v11 = vld [vmem:[#allocation5 + $0x580] sm:$0xff]  ;;  %2549 = vmatprep.subr.bf16.mxu1 %v4167_v8  ;;  %v4030_v18 = vcombine.low %v156_v6, %v160_v7 }
  0x48   :  { %v288_v12 = vld [vmem:[#allocation5 + $0x5a0] sm:$0xff]  ;;  %2550 = vmatpush1.bf16.msra.mxu1 %v4166_v9  ;;  %p4766_p1 = pnand %p4765_p0, %p4759_p11 }
  0x49   :  { %v148_v13 = vld [vmem:[#allocation5 + $0x140] sm:$0xff]  ;;  %v4159_v14 = vcombine.high %v284_v11, %v288_v12  ;;  %2508 = vmatprep.subr.bf16.mxu0 %v4031_v10  ;;  %v4158_v19 = vcombine.low %v284_v11, %v288_v12 }
  0x4a   :  { %v152_v15 = vld [vmem:[#allocation5 + $0x160] sm:$0xff]  ;;  %2509 = vmatpush1.bf16.msra.mxu0 %v4030_v18 }
  0x4b   :  { %v276_v16 = vld [vmem:[#allocation5 + $0x540] sm:$0xff]  ;;  %v4023_v20 = vcombine.high %v148_v13, %v152_v15  ;;  %2551 = vmatprep.subr.bf16.mxu1 %v4159_v14  ;;  %v4022_v26 = vcombine.low %v148_v13, %v152_v15 }
  0x4c   :  { %v280_v17 = vld [vmem:[#allocation5 + $0x560] sm:$0xff]  ;;  %2552 = vmatpush1.bf16.msra.mxu1 %v4158_v19 }
  0x4d   :  { %v4151_v21 = vcombine.high %v276_v16, %v280_v17  ;;  %v140_v22 = vld [vmem:[#allocation5 + $0x100] sm:$0xff]  ;;  %2510 = vmatprep.subr.bf16.mxu0 %v4023_v20  ;;  %v4150_v27 = vcombine.low %v276_v16, %v280_v17 }
  0x4e   :  { %v144_v23 = vld [vmem:[#allocation5 + $0x120] sm:$0xff]  ;;  %2511 = vmatpush1.bf16.msra.mxu0 %v4022_v26 }
  0x4f   :  { %v268_v24 = vld [vmem:[#allocation5 + $0x500] sm:$0xff]  ;;  %v4015_v28 = vcombine.high %v140_v22, %v144_v23  ;;  %2553 = vmatprep.subr.bf16.mxu1 %v4151_v21  ;;  %v4014_v34 = vcombine.low %v140_v22, %v144_v23 }
  0x50   :  { %v272_v25 = vld [vmem:[#allocation5 + $0x520] sm:$0xff]  ;;  %2554 = vmatpush1.bf16.msra.mxu1 %v4150_v27 }
  0x51   :  { %v4143_v29 = vcombine.high %v268_v24, %v272_v25  ;;  %v132_v30 = vld [vmem:[#allocation5 + $0xc0] sm:$0xff]  ;;  %2512 = vmatprep.subr.bf16.mxu0 %v4015_v28  ;;  %v4142_v35 = vcombine.low %v268_v24, %v272_v25 }
  0x52   :  { %v136_v31 = vld [vmem:[#allocation5 + $0xe0] sm:$0xff]  ;;  %2513 = vmatpush1.bf16.msra.mxu0 %v4014_v34 }
  0x53   :  { %v260_v32 = vld [vmem:[#allocation5 + $0x4c0] sm:$0xff]  ;;  %v4007_v36 = vcombine.high %v132_v30, %v136_v31  ;;  %2555 = vmatprep.subr.bf16.mxu1 %v4143_v29  ;;  %v4006_v42 = vcombine.low %v132_v30, %v136_v31 }
  0x54   :  { %v264_v33 = vld [vmem:[#allocation5 + $0x4e0] sm:$0xff]  ;;  %2556 = vmatpush1.bf16.msra.mxu1 %v4142_v35 }
  0x55   :  { %v4135_v37 = vcombine.high %v260_v32, %v264_v33  ;;  %v124_v38 = vld [vmem:[#allocation5 + $0x80] sm:$0xff]  ;;  %2514 = vmatprep.subr.bf16.mxu0 %v4007_v36  ;;  %v4134_v43 = vcombine.low %v260_v32, %v264_v33 }
  0x56   :  { %v128_v39 = vld [vmem:[#allocation5 + $0xa0] sm:$0xff]  ;;  %2515 = vmatpush1.bf16.msra.mxu0 %v4006_v42 }
  0x57   :  { %v252_v40 = vld [vmem:[#allocation5 + $0x480] sm:$0xff]  ;;  %v3999_v44 = vcombine.high %v124_v38, %v128_v39  ;;  %2557 = vmatprep.subr.bf16.mxu1 %v4135_v37  ;;  %v3998_v50 = vcombine.low %v124_v38, %v128_v39 }
  0x58   :  { %v256_v41 = vld [vmem:[#allocation5 + $0x4a0] sm:$0xff]  ;;  %2558 = vmatpush1.bf16.msra.mxu1 %v4134_v43 }
  0x59   :  { %v4127_v45 = vcombine.high %v252_v40, %v256_v41  ;;  %v116_v46 = vld [vmem:[#allocation5 + $0x40] sm:$0xff]  ;;  %2516 = vmatprep.subr.bf16.mxu0 %v3999_v44  ;;  %v4126_v51 = vcombine.low %v252_v40, %v256_v41 }
  0x5a   :  { %v120_v47 = vld [vmem:[#allocation5 + $0x60] sm:$0xff]  ;;  %2517 = vmatpush1.bf16.msra.mxu0 %v3998_v50 }
  0x5b   :  { %v244_v48 = vld [vmem:[#allocation5 + $0x440] sm:$0xff]  ;;  %v3991_v52 = vcombine.high %v116_v46, %v120_v47  ;;  %2559 = vmatprep.subr.bf16.mxu1 %v4127_v45  ;;  %v3990_v0 = vcombine.low %v116_v46, %v120_v47 }
  0x5c   :  { %v248_v49 = vld [vmem:[#allocation5 + $0x460] sm:$0xff]  ;;  %2560 = vmatpush1.bf16.msra.mxu1 %v4126_v51 }
  0x5d   :  { %v108_v53 = vld [vmem:[#allocation5] sm:$0xff]  ;;  %v4119_v56 = vcombine.high %v244_v48, %v248_v49  ;;  %2518 = vmatprep.subr.bf16.mxu0 %v3991_v52  ;;  %v4118_v1 = vcombine.low %v244_v48, %v248_v49 }
  0x5e   :  { %v112_v57 = vld [vmem:[#allocation5 + $0x20] sm:$0xff]  ;;  %2519 = vmatpush1.bf16.msra.mxu0 %v3990_v0 }
  0x5f   :  { %v97_v60 = vld [vmem:[#allocation2 + $0x50] sm:$0xff]  ;;  %v3983_v2 = vcombine.high %v108_v53, %v112_v57  ;;  %2561 = vmatprep.subr.bf16.mxu1 %v4119_v56  ;;  %v3982_v8 = vcombine.low %v108_v53, %v112_v57 }
  0x60   :  { %v236_v61 = vld [vmem:[#allocation5 + $0x400] sm:$0xff]  ;;  %v4848_v63 = vpack.c.bf16 %v97_v60, %v90_v59  ;;  %2562 = vmatpush1.bf16.msra.mxu1 %v4118_v1 }
  0x61   :  { %v240_v62 = vld [vmem:[#allocation5 + $0x420] sm:$0xff]  ;;  %2520 = vmatprep.subr.bf16.mxu0 %v3983_v2 }
  0x62   :  { %v4111_v3 = vcombine.high %v236_v61, %v240_v62  ;;  %v228_v4 = vld [vmem:[#allocation5 + $0x3c0] sm:$0xff]  ;;  %2581 = vmatprep.mubr.bf16.mxu1 %v4848_v63  ;;  %v4110_v9 = vcombine.low %v236_v61, %v240_v62  ;;  %2521 = vmatpush1.bf16.msra.mxu0 %v3982_v8 }
  0x63   :  { %v232_v5 = vld [vmem:[#allocation5 + $0x3e0] sm:$0xff] }
  0x64   :  { %v356_v6 = vld [vmem:[#allocation5 + $0x7c0] sm:$0xff]  ;;  %v4103_v10 = vcombine.high %v228_v4, %v232_v5  ;;  %2563 = vmatprep.subr.bf16.mxu1 %v4111_v3  ;;  %v4102_v16 = vcombine.low %v228_v4, %v232_v5 }
  0x65   :  { %v360_v7 = vld [vmem:[#allocation5 + $0x7e0] sm:$0xff]  ;;  %2564 = vmatpush1.bf16.msra.mxu1 %v4110_v9 }
  0x66   :  { %v4231_v11 = vcombine.high %v356_v6, %v360_v7  ;;  %v220_v12 = vld [vmem:[#allocation5 + $0x380] sm:$0xff]  ;;  %2522 = vmatprep.subr.bf16.mxu0 %v4103_v10  ;;  %v4230_v17 = vcombine.low %v356_v6, %v360_v7 }
  0x67   :  { %v224_v13 = vld [vmem:[#allocation5 + $0x3a0] sm:$0xff]  ;;  %2523 = vmatpush2.bf16.msra.mxu0 %v4102_v16 }
  0x68   :  { %v348_v14 = vld [vmem:[#allocation5 + $0x780] sm:$0xff]  ;;  %v4095_v18 = vcombine.high %v220_v12, %v224_v13  ;;  %2565 = vmatprep.subr.bf16.mxu1 %v4231_v11  ;;  %v4094_v24 = vcombine.low %v220_v12, %v224_v13  ;;  %v87_v11 = vld [vmem:[#allocation2] sm:$0xff]  ;;  %v94_v12 = vld [vmem:[#allocation2 + $0x38] sm:$0xff] }
  0x69   :  { %v352_v15 = vld [vmem:[#allocation5 + $0x7a0] sm:$0xff]  ;;  %2566 = vmatpush2.bf16.msra.mxu1 %v4230_v17 }
  0x6a   :  { %v4223_v19 = vcombine.high %v348_v14, %v352_v15  ;;  %v212_v20 = vld [vmem:[#allocation5 + $0x340] sm:$0xff]  ;;  %2524 = vmatprep.subr.bf16.mxu0 %v4095_v18  ;;  %v4222_v25 = vcombine.low %v348_v14, %v352_v15  ;;  %v96_v15 = vld [vmem:[#allocation2 + $0x48] sm:$0xff] }
  0x6b   :  { %v216_v21 = vld [vmem:[#allocation5 + $0x360] sm:$0xff]  ;;  %2525 = vmatpush2.bf16.msra.mxu0 %v4094_v24 }
  0x6c   :  { %v340_v22 = vld [vmem:[#allocation5 + $0x740] sm:$0xff]  ;;  %v4087_v26 = vcombine.high %v212_v20, %v216_v21  ;;  %2567 = vmatprep.subr.bf16.mxu1 %v4223_v19  ;;  %v4086_v32 = vcombine.low %v212_v20, %v216_v21  ;;  %v4852_v20 = vpack.c.bf16 %v94_v12, %v87_v11  ;;  %v165_v21 = vld [vmem:[#allocation5 + $0x1c8] sm:$0xff] }
  0x6d   :  { %v344_v23 = vld [vmem:[#allocation5 + $0x760] sm:$0xff]  ;;  %2568 = vmatpush2.bf16.msra.mxu1 %v4222_v25  ;;  %v92_v25 = vld [vmem:[#allocation2 + $0x28] sm:$0xff] }
  0x6e   :  { %v4215_v27 = vcombine.high %v340_v22, %v344_v23  ;;  %v204_v28 = vld [vmem:[#allocation5 + $0x300] sm:$0xff]  ;;  %2526 = vmatprep.subr.bf16.mxu0 %v4087_v26  ;;  %v4214_v33 = vcombine.low %v340_v22, %v344_v23  ;;  %v169_v22 = vld [vmem:[#allocation5 + $0x1e8] sm:$0xff]  ;;  %v99_v26 = vld [vmem:[#allocation2 + $0x60] sm:$0xff] }
  0x6f   :  { %v208_v29 = vld [vmem:[#allocation5 + $0x320] sm:$0xff]  ;;  %2527 = vmatpush2.bf16.msra.mxu0 %v4086_v32  ;;  %v4857_v32 = vpack.c.bf16 %v99_v26, %v92_v25  ;;  %v109_v26 = vld [vmem:[#allocation5 + $0x8] sm:$0xff] }
  0x70   :  { %v332_v30 = vld [vmem:[#allocation5 + $0x700] sm:$0xff]  ;;  %v4079_v34 = vcombine.high %v204_v28, %v208_v29  ;;  %2569 = vmatprep.subr.bf16.mxu1 %v4215_v27  ;;  %v4078_v40 = vcombine.low %v204_v28, %v208_v29  ;;  %v4041_v29 = vcombine.high %v165_v21, %v169_v22 }
  0x71   :  { %v336_v31 = vld [vmem:[#allocation5 + $0x720] sm:$0xff]  ;;  %2570 = vmatpush2.bf16.msra.mxu1 %v4214_v33 }
  0x72   :  { %v4207_v35 = vcombine.high %v332_v30, %v336_v31  ;;  %v196_v36 = vld [vmem:[#allocation5 + $0x2c0] sm:$0xff]  ;;  %2528 = vmatprep.subr.bf16.mxu0 %v4079_v34  ;;  %v4206_v41 = vcombine.low %v332_v30, %v336_v31 }
  0x73   :  { %v200_v37 = vld [vmem:[#allocation5 + $0x2e0] sm:$0xff]  ;;  %2529 = vmatpush2.bf16.msra.mxu0 %v4078_v40  ;;  %v4797_v40 = vmov 0  }
  0x74   :  { %v324_v38 = vld [vmem:[#allocation5 + $0x6c0] sm:$0xff]  ;;  %v4071_v42 = vcombine.high %v196_v36, %v200_v37  ;;  %2571 = vmatprep.subr.bf16.mxu1 %v4207_v35  ;;  %v4070_v48 = vcombine.low %v196_v36, %v200_v37  ;;  %v100_v35 = vld [vmem:[#allocation2 + $0x68] sm:$0xff]  ;;  %v157_v37 = vld [vmem:[#allocation5 + $0x188] sm:$0xff] }
  0x75   :  { %v328_v39 = vld [vmem:[#allocation5 + $0x6e0] sm:$0xff]  ;;  %2572 = vmatpush2.bf16.msra.mxu1 %v4206_v41 }
  0x76   :  { %v4199_v43 = vcombine.high %v324_v38, %v328_v39  ;;  %v188_v44 = vld [vmem:[#allocation5 + $0x280] sm:$0xff]  ;;  %2530 = vmatprep.subr.bf16.mxu0 %v4071_v42  ;;  %v4198_v49 = vcombine.low %v324_v38, %v328_v39  ;;  %v161_v38 = vld [vmem:[#allocation5 + $0x1a8] sm:$0xff] }
  0x77   :  { %v192_v45 = vld [vmem:[#allocation5 + $0x2a0] sm:$0xff]  ;;  %2531 = vmatpush2.bf16.msra.mxu0 %v4070_v48 }
  0x78   :  { %v316_v46 = vld [vmem:[#allocation5 + $0x680] sm:$0xff]  ;;  %v4063_v50 = vcombine.high %v188_v44, %v192_v45  ;;  %2573 = vmatprep.subr.bf16.mxu1 %v4199_v43  ;;  %v4062_v56 = vcombine.low %v188_v44, %v192_v45  ;;  %v4040_v44 = vcombine.low %v165_v21, %v169_v22 }
  0x79   :  { %v320_v47 = vld [vmem:[#allocation5 + $0x6a0] sm:$0xff]  ;;  %2574 = vmatpush2.bf16.msra.mxu1 %v4198_v49  ;;  %v4033_v49 = vcombine.high %v157_v37, %v161_v38 }
  0x7a   :  { %v4191_v51 = vcombine.high %v316_v46, %v320_v47  ;;  %v180_v52 = vld [vmem:[#allocation5 + $0x240] sm:$0xff]  ;;  %2532 = vmatprep.subr.bf16.mxu0 %v4063_v50  ;;  %v4190_v57 = vcombine.low %v316_v46, %v320_v47  ;;  %v149_v46 = vld [vmem:[#allocation5 + $0x148] sm:$0xff] }
  0x7b   :  { %v184_v53 = vld [vmem:[#allocation5 + $0x260] sm:$0xff]  ;;  %2533 = vmatpush2.bf16.msra.mxu0 %v4062_v56  ;;  %v153_v47 = vld [vmem:[#allocation5 + $0x168] sm:$0xff] }
  0x7c   :  { %v308_v54 = vld [vmem:[#allocation5 + $0x640] sm:$0xff]  ;;  %v4055_v59 = vcombine.high %v180_v52, %v184_v53  ;;  %2575 = vmatprep.subr.bf16.mxu1 %v4191_v51  ;;  %v4054_v2 = vcombine.low %v180_v52, %v184_v53  ;;  %v4032_v52 = vcombine.low %v157_v37, %v161_v38 }
  0x7d   :  { %v312_v55 = vld [vmem:[#allocation5 + $0x660] sm:$0xff]  ;;  %2576 = vmatpush2.bf16.msra.mxu1 %v4190_v57  ;;  %v4025_v57 = vcombine.high %v149_v46, %v153_v47 }
  0x7e   :  { %v4183_v60 = vcombine.high %v308_v54, %v312_v55  ;;  %v172_v61 = vld [vmem:[#allocation5 + $0x200] sm:$0xff]  ;;  %2534 = vmatprep.subr.bf16.mxu0 %v4055_v59  ;;  %v4182_v3 = vcombine.low %v308_v54, %v312_v55  ;;  %v141_v54 = vld [vmem:[#allocation5 + $0x108] sm:$0xff] }
  0x7f   :  { %v176_v62 = vld [vmem:[#allocation5 + $0x220] sm:$0xff]  ;;  %2535 = vmatpush2.bf16.msra.mxu0 %v4054_v2  ;;  %v145_v55 = vld [vmem:[#allocation5 + $0x128] sm:$0xff] }
  0x80   :  { %v300_v0 = vld [vmem:[#allocation5 + $0x600] sm:$0xff]  ;;  %v4047_v4 = vcombine.high %v172_v61, %v176_v62  ;;  %2577 = vmatprep.subr.bf16.mxu1 %v4183_v60  ;;  %v4046_v10 = vcombine.low %v172_v61, %v176_v62  ;;  %v4024_v61 = vcombine.low %v149_v46, %v153_v47  ;;  %v225_v46 = vld [vmem:[#allocation5 + $0x3a8] sm:$0xff] }
  0x81   :  { %v304_v1 = vld [vmem:[#allocation5 + $0x620] sm:$0xff]  ;;  %2578 = vmatpush2.bf16.msra.mxu1 %v4182_v3  ;;  %v4017_v3 = vcombine.high %v141_v54, %v145_v55 }
  0x82   :  { %v4175_v5 = vcombine.high %v300_v0, %v304_v1  ;;  %v420_v6 = vld [vmem:[#allocation5 + $0x9c0] sm:$0xff]  ;;  %2536 = vmatprep.subr.bf16.mxu0 %v4047_v4  ;;  %v4174_v13 = vcombine.low %v300_v0, %v304_v1  ;;  %v133_v0 = vld [vmem:[#allocation5 + $0xc8] sm:$0xff] }
  0x83   :  { %v424_v7 = vld [vmem:[#allocation5 + $0x9e0] sm:$0xff]  ;;  %2537 = vmatpush2.bf16.msra.mxu0 %v4046_v10  ;;  %v137_v1 = vld [vmem:[#allocation5 + $0xe8] sm:$0xff] }
  0x84   :  { %v492_v8 = vld [vmem:[#allocation5 + $0xc00] sm:$0xff]  ;;  %v4295_v16 = vcombine.high %v420_v6, %v424_v7  ;;  %2579 = vmatprep.subr.bf16.mxu1 %v4175_v5  ;;  %v4294_v24 = vcombine.low %v420_v6, %v424_v7  ;;  %v4016_v6 = vcombine.low %v141_v54, %v145_v55  ;;  %v4009_v11 = vcombine.high %v133_v0, %v137_v1  ;;  %v217_v54 = vld [vmem:[#allocation5 + $0x368] sm:$0xff] }
  0x85   :  { %v496_v9 = vld [vmem:[#allocation5 + $0xc20] sm:$0xff]  ;;  %2580 = vmatpush2.bf16.msra.mxu1 %v4174_v13 }
  0x86   :  { %v89_v14 = vld [vmem:[#allocation2 + $0x10] sm:$0xff]  ;;  %v4367_v17 = vcombine.high %v492_v8, %v496_v9  ;;  %2592 = vmatprep.subr.bf16.mxu0 %v4295_v16  ;;  %v4366_v27 = vcombine.low %v492_v8, %v496_v9  ;;  %2539 = vmatmul.mubr.bf16.vlgmr.msra.gmra.mxu0 %v4852_v20  ;;  %v125_v8 = vld [vmem:[#allocation5 + $0x88] sm:$0xff] }
  0x87   :  { %v412_v18 = vld [vmem:[#allocation5 + $0x980] sm:$0xff]  ;;  %v4854_v23 = vpack.c.bf16 %v96_v15, %v89_v14  ;;  %2593 = vmatpush1.bf16.msra.mxu0 %v4294_v24  ;;  %2624 = vmatprep.mubr.bf16.mxu0 %v4857_v32  ;;  %v129_v9 = vld [vmem:[#allocation5 + $0xa8] sm:$0xff]  ;;  %v4008_v14 = vcombine.low %v133_v0, %v137_v1 }
  0x88   :  { %v416_v19 = vld [vmem:[#allocation5 + $0x9a0] sm:$0xff]  ;;  %2649 = vmatprep.subr.bf16.mxu1 %v4367_v17  ;;  %v117_v16 = vld [vmem:[#allocation5 + $0x48] sm:$0xff]  ;;  %v4000_v24 = vcombine.low %v125_v8, %v129_v9 }
  0x89   :  { %v4287_v28 = vcombine.high %v412_v18, %v416_v19  ;;  %v404_v30 = vld [vmem:[#allocation5 + $0x940] sm:$0xff]  ;;  %2582 = vmatmul.mubr.bf16.vlgmr.msra.gmra.mxu1 %v4854_v23  ;;  %v4286_v33 = vcombine.low %v412_v18, %v416_v19  ;;  %v121_v17 = vld [vmem:[#allocation5 + $0x68] sm:$0xff]  ;;  %v4001_v19 = vcombine.high %v125_v8, %v129_v9 }
  0x8a   :  { %v408_v31 = vld [vmem:[#allocation5 + $0x960] sm:$0xff]  ;;  %2650 = vmatpush1.bf16.msra.mxu1 %v4366_v27  ;;  %2667 = vmatprep.mubr.bf16.mxu1 %v4797_v40  ;;  %v113_v27 = vld [vmem:[#allocation5 + $0x28] sm:$0xff] }
  0x8b   :  { %v93_v34 = vld [vmem:[#allocation2 + $0x30] sm:$0xff]  ;;  %2594 = vmatprep.subr.bf16.mxu0 %v4287_v28  ;;  %v4279_v36 = vcombine.high %v404_v30, %v408_v31  ;;  %2678 = vmatprep.subr.bf16.mxu1 %v4041_v29  ;;  %v4278_v42 = vcombine.low %v404_v30, %v408_v31  ;;  %v3993_v29 = vcombine.high %v117_v16, %v121_v17  ;;  %v209_v0 = vld [vmem:[#allocation5 + $0x328] sm:$0xff] }
  0x8c   :  { %v396_v39 = vld [vmem:[#allocation5 + $0x900] sm:$0xff]  ;;  %2595 = vmatpush1.bf16.msra.mxu0 %v4286_v33  ;;  %v4862_v43 = vpack.c.bf16 %v100_v35, %v93_v34  ;;  %v3992_v33 = vcombine.low %v117_v16, %v121_v17  ;;  %v229_v35 = vld [vmem:[#allocation5 + $0x3c8] sm:$0xff]  ;;  %v3985_v38 = vcombine.high %v109_v26, %v113_v27 }
  0x8d   :  { %v400_v41 = vld [vmem:[#allocation5 + $0x920] sm:$0xff]  ;;  %2596 = vmatprep.subr.bf16.mxu0 %v4279_v36  ;;  %v233_v36 = vld [vmem:[#allocation5 + $0x3e8] sm:$0xff] }
  0x8e   :  { %v4271_v45 = vcombine.high %v396_v39, %v400_v41  ;;  %v388_v48 = vld [vmem:[#allocation5 + $0x8c0] sm:$0xff]  ;;  %v4270_v51 = vcombine.low %v396_v39, %v400_v41  ;;  %v201_v8 = vld [vmem:[#allocation5 + $0x2e8] sm:$0xff] }
  0x8f   :  { %v392_v50 = vld [vmem:[#allocation5 + $0x8e0] sm:$0xff]  ;;  %v193_v16 = vld [vmem:[#allocation5 + $0x2a8] sm:$0xff] }
  0x90   :  { %2597 = vmatpush1.bf16.msra.mxu0 %v4278_v42  ;;  %v4263_v53 = vcombine.high %v388_v48, %v392_v50  ;;  %v380_v56 = vld [vmem:[#allocation5 + $0x880] sm:$0xff]  ;;  %v4262_v60 = vcombine.low %v388_v48, %v392_v50  ;;  %v3984_v42 = vcombine.low %v109_v26, %v113_v27  ;;  %v4105_v48 = vcombine.high %v229_v35, %v233_v36  ;;  %v185_v26 = vld [vmem:[#allocation5 + $0x268] sm:$0xff] }
  0x91   :  { %4374 = vmatmul.mubr.msk.bf16.vlgmr.msra.gmra.mxu1 %vm2502_vm0, %v4862_v43  ;;  %2598 = vmatprep.subr.bf16.mxu0 %v4271_v45  ;;  %v384_v59 = vld [vmem:[#allocation5 + $0x8a0] sm:$0xff]  ;;  %v221_v45 = vld [vmem:[#allocation5 + $0x388] sm:$0xff] }
  0x92   :  { %2679 = vmatpush1.bf16.msra.mxu1 %v4040_v44  ;;  %2710 = vmatprep.mubr.bf16.mxu1 %v4846_v58  ;;  %v4255_v62 = vcombine.high %v380_v56, %v384_v59  ;;  %v372_v2 = vld [vmem:[#allocation5 + $0x840] sm:$0xff]  ;;  %v4254_v5 = vcombine.low %v380_v56, %v384_v59  ;;  %v4097_v56 = vcombine.high %v221_v45, %v225_v46  ;;  %v293_v27 = vld [vmem:[#allocation5 + $0x5c8] sm:$0xff] }
  0x93   :  { %2680 = vmatprep.subr.bf16.mxu1 %v4033_v49  ;;  %v376_v4 = vld [vmem:[#allocation5 + $0x860] sm:$0xff] }
  0x94   :  { %2599 = vmatpush1.bf16.msra.mxu0 %v4270_v51  ;;  %v4247_v7 = vcombine.high %v372_v2, %v376_v4  ;;  %v364_v10 = vld [vmem:[#allocation5 + $0x800] sm:$0xff]  ;;  %v4246_v13 = vcombine.low %v372_v2, %v376_v4  ;;  %v4104_v51 = vcombine.low %v229_v35, %v233_v36  ;;  %v173_v36 = vld [vmem:[#allocation5 + $0x208] sm:$0xff] }
  0x95   :  { %2600 = vmatprep.subr.bf16.mxu0 %v4263_v53  ;;  %v368_v12 = vld [vmem:[#allocation5 + $0x820] sm:$0xff]  ;;  %v213_v53 = vld [vmem:[#allocation5 + $0x348] sm:$0xff] }
  0x96   :  { %2681 = vmatpush1.bf16.msra.mxu1 %v4032_v52  ;;  %v4239_v15 = vcombine.high %v364_v10, %v368_v12  ;;  %v484_v18 = vld [vmem:[#allocation5 + $0xbc0] sm:$0xff]  ;;  %v4238_v22 = vcombine.low %v364_v10, %v368_v12  ;;  %v4089_v2 = vcombine.high %v213_v53, %v217_v54 }
  0x97   :  { %2682 = vmatprep.subr.bf16.mxu1 %v4025_v57  ;;  %v488_v21 = vld [vmem:[#allocation5 + $0xbe0] sm:$0xff] }
  0x98   :  { %2601 = vmatpush1.bf16.msra.mxu0 %v4262_v60  ;;  %v4359_v25 = vcombine.high %v484_v18, %v488_v21  ;;  %v476_v28 = vld [vmem:[#allocation5 + $0xb80] sm:$0xff]  ;;  %v4358_v31 = vcombine.low %v484_v18, %v488_v21  ;;  %v4096_v60 = vcombine.low %v221_v45, %v225_v46 }
  0x99   :  { %2602 = vmatprep.subr.bf16.mxu0 %v4255_v62  ;;  %v480_v30 = vld [vmem:[#allocation5 + $0xba0] sm:$0xff]  ;;  %v205_v62 = vld [vmem:[#allocation5 + $0x308] sm:$0xff] }
  0x9a   :  { %2683 = vmatpush1.bf16.msra.mxu1 %v4024_v61  ;;  %v4351_v34 = vcombine.high %v476_v28, %v480_v30  ;;  %v468_v37 = vld [vmem:[#allocation5 + $0xb40] sm:$0xff]  ;;  %v4350_v41 = vcombine.low %v476_v28, %v480_v30  ;;  %v4081_v10 = vcombine.high %v205_v62, %v209_v0  ;;  %v98_v30 = vld [vmem:[#allocation2 + $0x58] sm:$0xff] }
  0x9b   :  { %2684 = vmatprep.subr.bf16.mxu1 %v4017_v3  ;;  %v472_v39 = vld [vmem:[#allocation5 + $0xb60] sm:$0xff] }
  0x9c   :  { %2603 = vmatpush1.bf16.msra.mxu0 %v4254_v5  ;;  %v4343_v44 = vcombine.high %v468_v37, %v472_v39  ;;  %v460_v47 = vld [vmem:[#allocation5 + $0xb00] sm:$0xff]  ;;  %v4342_v50 = vcombine.low %v468_v37, %v472_v39  ;;  %v4088_v5 = vcombine.low %v213_v53, %v217_v54  ;;  %v177_v37 = vld [vmem:[#allocation5 + $0x228] sm:$0xff] }
  0x9d   :  { %2604 = vmatprep.subr.bf16.mxu0 %v4247_v7  ;;  %v464_v49 = vld [vmem:[#allocation5 + $0xb20] sm:$0xff]  ;;  %v197_v7 = vld [vmem:[#allocation5 + $0x2c8] sm:$0xff]  ;;  %v4048_v53 = vcombine.low %v173_v36, %v177_v37 }
  0x9e   :  { %2685 = vmatpush1.bf16.msra.mxu1 %v4016_v6  ;;  %v4335_v52 = vcombine.high %v460_v47, %v464_v49  ;;  %v452_v55 = vld [vmem:[#allocation5 + $0xac0] sm:$0xff]  ;;  %v4334_v59 = vcombine.low %v460_v47, %v464_v49  ;;  %v4073_v18 = vcombine.high %v197_v7, %v201_v8  ;;  %v421_v47 = vld [vmem:[#allocation5 + $0x9c8] sm:$0xff]  ;;  %v4049_v49 = vcombine.high %v173_v36, %v177_v37 }
  0x9f   :  { %2686 = vmatprep.subr.bf16.mxu1 %v4009_v11  ;;  %v456_v57 = vld [vmem:[#allocation5 + $0xae0] sm:$0xff]  ;;  %v357_v37 = vld [vmem:[#allocation5 + $0x7c8] sm:$0xff] }
  0xa0   :  { %2605 = vmatpush1.bf16.msra.mxu0 %v4246_v13  ;;  %v4327_v61 = vcombine.high %v452_v55, %v456_v57  ;;  %v444_v1 = vld [vmem:[#allocation5 + $0xa80] sm:$0xff]  ;;  %v4326_v4 = vcombine.low %v452_v55, %v456_v57  ;;  %v4080_v13 = vcombine.low %v205_v62, %v209_v0  ;;  %v269_v55 = vld [vmem:[#allocation5 + $0x508] sm:$0xff] }
  0xa1   :  { %2606 = vmatprep.subr.bf16.mxu0 %v4239_v15  ;;  %v448_v3 = vld [vmem:[#allocation5 + $0xaa0] sm:$0xff]  ;;  %v189_v15 = vld [vmem:[#allocation5 + $0x288] sm:$0xff] }
  0xa2   :  { %2687 = vmatpush1.bf16.msra.mxu1 %v4008_v14  ;;  %v4319_v6 = vcombine.high %v444_v1, %v448_v3  ;;  %v436_v9 = vld [vmem:[#allocation5 + $0xa40] sm:$0xff]  ;;  %v4318_v12 = vcombine.low %v444_v1, %v448_v3  ;;  %v4065_v28 = vcombine.high %v189_v15, %v193_v16  ;;  %v273_v57 = vld [vmem:[#allocation5 + $0x528] sm:$0xff] }
  0xa3   :  { %2688 = vmatprep.subr.bf16.mxu1 %v4001_v19  ;;  %v440_v11 = vld [vmem:[#allocation5 + $0xa60] sm:$0xff]  ;;  %v4145_v0 = vcombine.high %v269_v55, %v273_v57  ;;  %v265_v3 = vld [vmem:[#allocation5 + $0x4e8] sm:$0xff] }
  0xa4   :  { %2607 = vmatpush1.bf16.msra.mxu0 %v4238_v22  ;;  %v4311_v14 = vcombine.high %v436_v9, %v440_v11  ;;  %v428_v17 = vld [vmem:[#allocation5 + $0xa00] sm:$0xff]  ;;  %v4310_v21 = vcombine.low %v436_v9, %v440_v11  ;;  %v4072_v22 = vcombine.low %v197_v7, %v201_v8  ;;  %v257_v11 = vld [vmem:[#allocation5 + $0x4a8] sm:$0xff] }
  0xa5   :  { %2608 = vmatprep.subr.bf16.mxu0 %v4359_v25  ;;  %v432_v19 = vld [vmem:[#allocation5 + $0xa20] sm:$0xff]  ;;  %v181_v25 = vld [vmem:[#allocation5 + $0x248] sm:$0xff] }
  0xa6   :  { %2689 = vmatpush1.bf16.msra.mxu1 %v4000_v24  ;;  %v4303_v24 = vcombine.high %v428_v17, %v432_v19  ;;  %v4057_v39 = vcombine.high %v181_v25, %v185_v26  ;;  %v4056_v45 = vcombine.low %v181_v25, %v185_v26 }
  0xa7   :  { %2690 = vmatprep.subr.bf16.mxu1 %v3993_v29  ;;  %v91_v29 = vld [vmem:[#allocation2 + $0x20] sm:$0xff] }
  0xa8   :  { %2609 = vmatpush2.bf16.msra.mxu0 %v4358_v31  ;;  %v297_v31 = vld [vmem:[#allocation5 + $0x5e8] sm:$0xff] }
  0xa9   :  { %2610 = vmatprep.subr.bf16.mxu0 %v4351_v34  ;;  %v4064_v34 = vcombine.low %v189_v15, %v193_v16  ;;  %v4169_v35 = vcombine.high %v293_v27, %v297_v31 }
  0xaa   :  { %2691 = vmatpush1.bf16.msra.mxu1 %v3992_v33  ;;  %v4302_v33 = vcombine.low %v428_v17, %v432_v19  ;;  %v249_v19 = vld [vmem:[#allocation5 + $0x468] sm:$0xff] }
  0xab   :  { %2692 = vmatprep.subr.bf16.mxu1 %v3985_v38  ;;  %v285_v38 = vld [vmem:[#allocation5 + $0x588] sm:$0xff] }
  0xac   :  { %2611 = vmatpush2.bf16.msra.mxu0 %v4350_v41  ;;  %v289_v41 = vld [vmem:[#allocation5 + $0x5a8] sm:$0xff] }
  0xad   :  { %2612 = vmatprep.subr.bf16.mxu0 %v4343_v44  ;;  %v4168_v44 = vcombine.low %v293_v27, %v297_v31  ;;  %v4161_v46 = vcombine.high %v285_v38, %v289_v41  ;;  %v385_v31 = vld [vmem:[#allocation5 + $0x8a8] sm:$0xff] }
  0xae   :  { %2693 = vmatpush1.bf16.msra.mxu1 %v3984_v42  ;;  %v4867_v42 = vpack.c.bf16 %v98_v30, %v91_v29  ;;  %v241_v29 = vld [vmem:[#allocation5 + $0x428] sm:$0xff] }
  0xaf   :  { %2694 = vmatprep.subr.bf16.mxu1 %v4105_v48  ;;  %v425_v48 = vld [vmem:[#allocation5 + $0x9e8] sm:$0xff] }
  0xb0   :  { %2613 = vmatpush2.bf16.msra.mxu0 %v4342_v50  ;;  %v277_v50 = vld [vmem:[#allocation5 + $0x548] sm:$0xff]  ;;  %v4296_v62 = vcombine.low %v421_v47, %v425_v48 }
  0xb1   :  { %2614 = vmatprep.subr.bf16.mxu0 %v4335_v52  ;;  %v4160_v52 = vcombine.low %v285_v38, %v289_v41  ;;  %v381_v30 = vld [vmem:[#allocation5 + $0x888] sm:$0xff] }
  0xb2   :  { %2695 = vmatpush2.bf16.msra.mxu1 %v4104_v51  ;;  %v281_v51 = vld [vmem:[#allocation5 + $0x568] sm:$0xff]  ;;  %v4257_v36 = vcombine.high %v381_v30, %v385_v31 }
  0xb3   :  { %2696 = vmatprep.subr.bf16.mxu1 %v4097_v56  ;;  %v4153_v54 = vcombine.high %v277_v50, %v281_v51  ;;  %v4297_v56 = vcombine.high %v421_v47, %v425_v48  ;;  %v361_v38 = vld [vmem:[#allocation5 + $0x7e8] sm:$0xff] }
  0xb4   :  { %2615 = vmatpush2.bf16.msra.mxu0 %v4334_v59  ;;  %v413_v59 = vld [vmem:[#allocation5 + $0x988] sm:$0xff] }
  0xb5   :  { %2616 = vmatprep.subr.bf16.mxu0 %v4327_v61  ;;  %v4152_v61 = vcombine.low %v277_v50, %v281_v51  ;;  %v377_v41 = vld [vmem:[#allocation5 + $0x868] sm:$0xff] }
  0xb6   :  { %2697 = vmatpush2.bf16.msra.mxu1 %v4096_v60  ;;  %v417_v60 = vld [vmem:[#allocation5 + $0x9a8] sm:$0xff] }
  0xb7   :  { %2698 = vmatprep.subr.bf16.mxu1 %v4089_v2  ;;  %v4289_v1 = vcombine.high %v413_v59, %v417_v60  ;;  %v261_v2 = vld [vmem:[#allocation5 + $0x4c8] sm:$0xff]  ;;  %v4288_v7 = vcombine.low %v413_v59, %v417_v60 }
  0xb8   :  { %2617 = vmatpush2.bf16.msra.mxu0 %v4326_v4  ;;  %v405_v4 = vld [vmem:[#allocation5 + $0x948] sm:$0xff]  ;;  %v4137_v8 = vcombine.high %v261_v2, %v265_v3 }
  0xb9   :  { %2618 = vmatprep.subr.bf16.mxu0 %v4319_v6  ;;  %v4144_v6 = vcombine.low %v269_v55, %v273_v57  ;;  %v349_v48 = vld [vmem:[#allocation5 + $0x788] sm:$0xff] }
  0xba   :  { %2699 = vmatpush2.bf16.msra.mxu1 %v4088_v5  ;;  %v409_v5 = vld [vmem:[#allocation5 + $0x968] sm:$0xff] }
  0xbb   :  { %2700 = vmatprep.subr.bf16.mxu1 %v4081_v10  ;;  %v4281_v9 = vcombine.high %v405_v4, %v409_v5  ;;  %v253_v10 = vld [vmem:[#allocation5 + $0x488] sm:$0xff]  ;;  %v4280_v15 = vcombine.low %v405_v4, %v409_v5 }
  0xbc   :  { %2619 = vmatpush2.bf16.msra.mxu0 %v4318_v12  ;;  %v397_v12 = vld [vmem:[#allocation5 + $0x908] sm:$0xff]  ;;  %v4129_v16 = vcombine.high %v253_v10, %v257_v11 }
  0xbd   :  { %2620 = vmatprep.subr.bf16.mxu0 %v4311_v14  ;;  %v4136_v14 = vcombine.low %v261_v2, %v265_v3  ;;  %v365_v50 = vld [vmem:[#allocation5 + $0x808] sm:$0xff] }
  0xbe   :  { %2701 = vmatpush2.bf16.msra.mxu1 %v4080_v13  ;;  %v401_v13 = vld [vmem:[#allocation5 + $0x928] sm:$0xff] }
  0xbf   :  { %2702 = vmatprep.subr.bf16.mxu1 %v4073_v18  ;;  %v4273_v17 = vcombine.high %v397_v12, %v401_v13  ;;  %v245_v18 = vld [vmem:[#allocation5 + $0x448] sm:$0xff]  ;;  %v4272_v25 = vcombine.low %v397_v12, %v401_v13 }
  0xc0   :  { %2621 = vmatpush2.bf16.msra.mxu0 %v4310_v21  ;;  %v389_v21 = vld [vmem:[#allocation5 + $0x8c8] sm:$0xff]  ;;  %v4121_v26 = vcombine.high %v245_v18, %v249_v19 }
  0xc1   :  { %2622 = vmatprep.subr.bf16.mxu0 %v4303_v24  ;;  %v4128_v24 = vcombine.low %v253_v10, %v257_v11  ;;  %v369_v51 = vld [vmem:[#allocation5 + $0x828] sm:$0xff] }
  0xc2   :  { %2703 = vmatpush2.bf16.msra.mxu1 %v4072_v22  ;;  %v393_v22 = vld [vmem:[#allocation5 + $0x8e8] sm:$0xff]  ;;  %v4241_v55 = vcombine.high %v365_v50, %v369_v51 }
  0xc3   :  { %2704 = vmatprep.subr.bf16.mxu1 %v4065_v28  ;;  %v4265_v27 = vcombine.high %v389_v21, %v393_v22  ;;  %v237_v28 = vld [vmem:[#allocation5 + $0x408] sm:$0xff] }
  0xc4   :  { %2623 = vmatpush2.bf16.msra.mxu0 %v4302_v33  ;;  %v4120_v33 = vcombine.low %v245_v18, %v249_v19  ;;  %v345_v57 = vld [vmem:[#allocation5 + $0x768] sm:$0xff] }
  0xc5   :  { %2721 = vmatprep.subr.bf16.mxu0 %v4169_v35  ;;  %v4113_v35 = vcombine.high %v237_v28, %v241_v29  ;;  %v485_v59 = vld [vmem:[#allocation5 + $0xbc8] sm:$0xff] }
  0xc6   :  { %2705 = vmatpush2.bf16.msra.mxu1 %v4064_v34  ;;  %v4264_v34 = vcombine.low %v389_v21, %v393_v22  ;;  %v489_v60 = vld [vmem:[#allocation5 + $0xbe8] sm:$0xff] }
  0xc7   :  { %2706 = vmatprep.subr.bf16.mxu1 %v4057_v39  ;;  %2625 = vmatmul.mubr.bf16.vlgmr.msra.gmra.mxu0 %v4867_v42  ;;  %v373_v39 = vld [vmem:[#allocation5 + $0x848] sm:$0xff] }
  0xc8   :  { %2722 = vmatpush1.bf16.msra.mxu0 %v4168_v44  ;;  %2753 = vmatprep.mubr.bf16.mxu0 %v4848_v63  ;;  %v4112_v44 = vcombine.low %v237_v28, %v241_v29  ;;  %v4249_v47 = vcombine.high %v373_v39, %v377_v41  ;;  %v333_v2 = vld [vmem:[#allocation5 + $0x708] sm:$0xff] }
  0xc9   :  { %2723 = vmatprep.subr.bf16.mxu0 %v4161_v46  ;;  %v4233_v46 = vcombine.high %v357_v37, %v361_v38  ;;  %v337_v3 = vld [vmem:[#allocation5 + $0x728] sm:$0xff] }
  0xca   :  { %2707 = vmatpush2.bf16.msra.mxu1 %v4056_v45  ;;  %v4256_v45 = vcombine.low %v381_v30, %v385_v31  ;;  %v477_v4 = vld [vmem:[#allocation5 + $0xb88] sm:$0xff] }
  0xcb   :  { %2708 = vmatprep.subr.bf16.mxu1 %v4049_v49  ;;  %v353_v49 = vld [vmem:[#allocation5 + $0x7a8] sm:$0xff] }
  0xcc   :  { %2724 = vmatpush1.bf16.msra.mxu0 %v4160_v52  ;;  %v4232_v52 = vcombine.low %v357_v37, %v361_v38  ;;  %v481_v5 = vld [vmem:[#allocation5 + $0xba8] sm:$0xff] }
  0xcd   :  { %2725 = vmatprep.subr.bf16.mxu0 %v4153_v54  ;;  %v4225_v54 = vcombine.high %v349_v48, %v353_v49  ;;  %v325_v10 = vld [vmem:[#allocation5 + $0x6c8] sm:$0xff] }
  0xce   :  { %2709 = vmatpush2.bf16.msra.mxu1 %v4048_v53  ;;  %v4248_v53 = vcombine.low %v373_v39, %v377_v41  ;;  %v329_v11 = vld [vmem:[#allocation5 + $0x6e8] sm:$0xff] }
  0xcf   :  { %2764 = vmatprep.subr.bf16.mxu1 %v4297_v56  ;;  %v341_v56 = vld [vmem:[#allocation5 + $0x748] sm:$0xff] }
  0xd0   :  { %2726 = vmatpush1.bf16.msra.mxu0 %v4152_v61  ;;  %v4224_v61 = vcombine.low %v349_v48, %v353_v49  ;;  %v469_v12 = vld [vmem:[#allocation5 + $0xb48] sm:$0xff] }
  0xd1   :  { %2711 = vmatmul.mubr.bf16.vlgmr.msra.gmra.mxu1 %v4852_v20  ;;  %2727 = vmatprep.subr.bf16.mxu0 %v4145_v0  ;;  %v4217_v0 = vcombine.high %v341_v56, %v345_v57  ;;  %v473_v13 = vld [vmem:[#allocation5 + $0xb68] sm:$0xff] }
  0xd2   :  { %2765 = vmatpush1.bf16.msra.mxu1 %v4296_v62  ;;  %2796 = vmatprep.mubr.bf16.mxu1 %v4857_v32  ;;  %v4240_v62 = vcombine.low %v365_v50, %v369_v51  ;;  %v317_v18 = vld [vmem:[#allocation5 + $0x688] sm:$0xff] }
  0xd3   :  { %2766 = vmatprep.subr.bf16.mxu1 %v4289_v1  ;;  %v4361_v1 = vcombine.high %v485_v59, %v489_v60  ;;  %v321_v19 = vld [vmem:[#allocation5 + $0x6a8] sm:$0xff] }
  0xd4   :  { %2728 = vmatpush1.bf16.msra.mxu0 %v4144_v6  ;;  %v4216_v6 = vcombine.low %v341_v56, %v345_v57  ;;  %v461_v21 = vld [vmem:[#allocation5 + $0xb08] sm:$0xff]  ;;  %v166_v56 = vld [vmem:[#allocation5 + $0x1d0] sm:$0xff] }
  0xd5   :  { %2729 = vmatprep.subr.bf16.mxu0 %v4137_v8  ;;  %v4209_v8 = vcombine.high %v333_v2, %v337_v3  ;;  %v465_v22 = vld [vmem:[#allocation5 + $0xb28] sm:$0xff]  ;;  %v170_v57 = vld [vmem:[#allocation5 + $0x1f0] sm:$0xff] }
  0xd6   :  { %2767 = vmatpush1.bf16.msra.mxu1 %v4288_v7  ;;  %v4360_v7 = vcombine.low %v485_v59, %v489_v60  ;;  %v309_v28 = vld [vmem:[#allocation5 + $0x648] sm:$0xff] }
  0xd7   :  { %2768 = vmatprep.subr.bf16.mxu1 %v4281_v9  ;;  %v4353_v9 = vcombine.high %v477_v4, %v481_v5  ;;  %v313_v29 = vld [vmem:[#allocation5 + $0x668] sm:$0xff] }
  0xd8   :  { %2730 = vmatpush1.bf16.msra.mxu0 %v4136_v14  ;;  %v4208_v14 = vcombine.low %v333_v2, %v337_v3  ;;  %v453_v30 = vld [vmem:[#allocation5 + $0xac8] sm:$0xff]  ;;  %v294_v2 = vld [vmem:[#allocation5 + $0x5d0] sm:$0xff] }
  0xd9   :  { %2731 = vmatprep.subr.bf16.mxu0 %v4129_v16  ;;  %v4201_v16 = vcombine.high %v325_v10, %v329_v11  ;;  %v457_v31 = vld [vmem:[#allocation5 + $0xae8] sm:$0xff]  ;;  %v298_v3 = vld [vmem:[#allocation5 + $0x5f0] sm:$0xff] }
  0xda   :  { %2769 = vmatpush1.bf16.msra.mxu1 %v4280_v15  ;;  %v4352_v15 = vcombine.low %v477_v4, %v481_v5  ;;  %v301_v37 = vld [vmem:[#allocation5 + $0x608] sm:$0xff]  ;;  %v4171_v5 = vcombine.high %v294_v2, %v298_v3 }
  0xdb   :  { %2770 = vmatprep.subr.bf16.mxu1 %v4273_v17  ;;  %v4345_v17 = vcombine.high %v469_v12, %v473_v13  ;;  %v305_v38 = vld [vmem:[#allocation5 + $0x628] sm:$0xff] }
  0xdc   :  { %2732 = vmatpush1.bf16.msra.mxu0 %v4128_v24  ;;  %v4200_v24 = vcombine.low %v325_v10, %v329_v11  ;;  %v445_v39 = vld [vmem:[#allocation5 + $0xa88] sm:$0xff]  ;;  %v4042_v10 = vcombine.low %v166_v56, %v170_v57  ;;  %v4170_v11 = vcombine.low %v294_v2, %v298_v3 }
  0xdd   :  { %2733 = vmatprep.subr.bf16.mxu0 %v4121_v26  ;;  %v4193_v26 = vcombine.high %v317_v18, %v321_v19  ;;  %v449_v41 = vld [vmem:[#allocation5 + $0xaa8] sm:$0xff] }
  0xde   :  { %2771 = vmatpush1.bf16.msra.mxu1 %v4272_v25  ;;  %v4344_v25 = vcombine.low %v469_v12, %v473_v13  ;;  %v493_v48 = vld [vmem:[#allocation5 + $0xc08] sm:$0xff] }
  0xdf   :  { %2772 = vmatprep.subr.bf16.mxu1 %v4265_v27  ;;  %v4337_v27 = vcombine.high %v461_v21, %v465_v22  ;;  %v497_v49 = vld [vmem:[#allocation5 + $0xc28] sm:$0xff] }
  0xe0   :  { %2734 = vmatpush1.bf16.msra.mxu0 %v4120_v33  ;;  %v4192_v33 = vcombine.low %v317_v18, %v321_v19  ;;  %v437_v50 = vld [vmem:[#allocation5 + $0xa48] sm:$0xff] }
  0xe1   :  { %2735 = vmatprep.subr.bf16.mxu0 %v4113_v35  ;;  %v4185_v35 = vcombine.high %v309_v28, %v313_v29  ;;  %v441_v51 = vld [vmem:[#allocation5 + $0xa68] sm:$0xff] }
  0xe2   :  { %2773 = vmatpush1.bf16.msra.mxu1 %v4264_v34  ;;  %v4336_v34 = vcombine.low %v461_v21, %v465_v22  ;;  %v429_v59 = vld [vmem:[#allocation5 + $0xa08] sm:$0xff] }
  0xe3   :  { %2774 = vmatprep.subr.bf16.mxu1 %v4257_v36  ;;  %v4329_v36 = vcombine.high %v453_v30, %v457_v31  ;;  %v433_v60 = vld [vmem:[#allocation5 + $0xa28] sm:$0xff] }
  0xe4   :  { %2736 = vmatpush1.bf16.msra.mxu0 %v4112_v44  ;;  %v4184_v44 = vcombine.low %v309_v28, %v313_v29  ;;  %v4304_v4 = vcombine.low %v429_v59, %v433_v60 }
  0xe5   :  { %2737 = vmatprep.subr.bf16.mxu0 %v4233_v46  ;;  %v4177_v46 = vcombine.high %v301_v37, %v305_v38 }
  0xe6   :  { %2775 = vmatpush1.bf16.msra.mxu1 %v4256_v45  ;;  %v4328_v45 = vcombine.low %v453_v30, %v457_v31 }
  0xe7   :  { %2776 = vmatprep.subr.bf16.mxu1 %v4249_v47  ;;  %v4321_v47 = vcombine.high %v445_v39, %v449_v41 }
  0xe8   :  { %2738 = vmatpush2.bf16.msra.mxu0 %v4232_v52  ;;  %v4176_v52 = vcombine.low %v301_v37, %v305_v38 }
  0xe9   :  { %2739 = vmatprep.subr.bf16.mxu0 %v4225_v54  ;;  %v4369_v54 = vcombine.high %v493_v48, %v497_v49 }
  0xea   :  { %2777 = vmatpush1.bf16.msra.mxu1 %v4248_v53  ;;  %v4320_v53 = vcombine.low %v445_v39, %v449_v41 }
  0xeb   :  { %2778 = vmatprep.subr.bf16.mxu1 %v4241_v55  ;;  %v4313_v55 = vcombine.high %v437_v50, %v441_v51 }
  0xec   :  { %2740 = vmatpush2.bf16.msra.mxu0 %v4224_v61  ;;  %v4368_v61 = vcombine.low %v493_v48, %v497_v49 }
  0xed   :  { %2741 = vmatprep.subr.bf16.mxu0 %v4217_v0  ;;  %v4043_v0 = vcombine.high %v166_v56, %v170_v57 }
  0xee   :  { %2779 = vmatpush1.bf16.msra.mxu1 %v4240_v62  ;;  %v4312_v62 = vcombine.low %v437_v50, %v441_v51 }
  0xef   :  { %2780 = vmatprep.subr.bf16.mxu1 %v4361_v1  ;;  %v4305_v1 = vcombine.high %v429_v59, %v433_v60 }
  0xf0   :  { %2742 = vmatpush2.bf16.msra.mxu0 %v4216_v6  ;;  %v158_v6 = vld [vmem:[#allocation5 + $0x190] sm:$0xff] }
  0xf1   :  { %2743 = vmatprep.subr.bf16.mxu0 %v4209_v8  ;;  %v286_v8 = vld [vmem:[#allocation5 + $0x590] sm:$0xff] }
  0xf2   :  { %2781 = vmatpush2.bf16.msra.mxu1 %v4360_v7  ;;  %v162_v7 = vld [vmem:[#allocation5 + $0x1b0] sm:$0xff] }
  0xf3   :  { %2782 = vmatprep.subr.bf16.mxu1 %v4353_v9  ;;  %v290_v9 = vld [vmem:[#allocation5 + $0x5b0] sm:$0xff]  ;;  %v4035_v12 = vcombine.high %v158_v6, %v162_v7  ;;  %v4034_v18 = vcombine.low %v158_v6, %v162_v7 }
  0xf4   :  { %2744 = vmatpush2.bf16.msra.mxu0 %v4208_v14  ;;  %v4163_v13 = vcombine.high %v286_v8, %v290_v9  ;;  %v150_v14 = vld [vmem:[#allocation5 + $0x150] sm:$0xff]  ;;  %v4162_v19 = vcombine.low %v286_v8, %v290_v9 }
  0xf5   :  { %2745 = vmatprep.subr.bf16.mxu0 %v4201_v16  ;;  %v278_v16 = vld [vmem:[#allocation5 + $0x550] sm:$0xff] }
  0xf6   :  { %2783 = vmatpush2.bf16.msra.mxu1 %v4352_v15  ;;  %v154_v15 = vld [vmem:[#allocation5 + $0x170] sm:$0xff] }
  0xf7   :  { %2784 = vmatprep.subr.bf16.mxu1 %v4345_v17  ;;  %v282_v17 = vld [vmem:[#allocation5 + $0x570] sm:$0xff]  ;;  %v4027_v21 = vcombine.high %v150_v14, %v154_v15  ;;  %v4026_v28 = vcombine.low %v150_v14, %v154_v15 }
  0xf8   :  { %2746 = vmatpush2.bf16.msra.mxu0 %v4200_v24  ;;  %v4155_v22 = vcombine.high %v278_v16, %v282_v17  ;;  %v142_v24 = vld [vmem:[#allocation5 + $0x110] sm:$0xff]  ;;  %v4154_v29 = vcombine.low %v278_v16, %v282_v17 }
  0xf9   :  { %2747 = vmatprep.subr.bf16.mxu0 %v4193_v26  ;;  %v270_v26 = vld [vmem:[#allocation5 + $0x510] sm:$0xff] }
  0xfa   :  { %2785 = vmatpush2.bf16.msra.mxu1 %v4344_v25  ;;  %v146_v25 = vld [vmem:[#allocation5 + $0x130] sm:$0xff] }
  0xfb   :  { %2786 = vmatprep.subr.bf16.mxu1 %v4337_v27  ;;  %v274_v27 = vld [vmem:[#allocation5 + $0x530] sm:$0xff]  ;;  %v4019_v30 = vcombine.high %v142_v24, %v146_v25  ;;  %v4018_v37 = vcombine.low %v142_v24, %v146_v25 }
  0xfc   :  { %2748 = vmatpush2.bf16.msra.mxu0 %v4192_v33  ;;  %v4147_v31 = vcombine.high %v270_v26, %v274_v27  ;;  %v134_v33 = vld [vmem:[#allocation5 + $0xd0] sm:$0xff]  ;;  %v4146_v38 = vcombine.low %v270_v26, %v274_v27 }
  0xfd   :  { %2749 = vmatprep.subr.bf16.mxu0 %v4185_v35  ;;  %v262_v35 = vld [vmem:[#allocation5 + $0x4d0] sm:$0xff] }
  0xfe   :  { %2787 = vmatpush2.bf16.msra.mxu1 %v4336_v34  ;;  %v138_v34 = vld [vmem:[#allocation5 + $0xf0] sm:$0xff] }
  0xff   :  { %2788 = vmatprep.subr.bf16.mxu1 %v4329_v36  ;;  %v266_v36 = vld [vmem:[#allocation5 + $0x4f0] sm:$0xff]  ;;  %v4011_v39 = vcombine.high %v134_v33, %v138_v34  ;;  %v4010_v48 = vcombine.low %v134_v33, %v138_v34 }
 0x100   :  { %2750 = vmatpush2.bf16.msra.mxu0 %v4184_v44  ;;  %v4139_v41 = vcombine.high %v262_v35, %v266_v36  ;;  %v126_v44 = vld [vmem:[#allocation5 + $0x90] sm:$0xff]  ;;  %v4138_v49 = vcombine.low %v262_v35, %v266_v36 }
 0x101   :  { %2751 = vmatprep.subr.bf16.mxu0 %v4177_v46  ;;  %v254_v46 = vld [vmem:[#allocation5 + $0x490] sm:$0xff] }
 0x102   :  { %2789 = vmatpush2.bf16.msra.mxu1 %v4328_v45  ;;  %v130_v45 = vld [vmem:[#allocation5 + $0xb0] sm:$0xff] }
 0x103   :  { %2790 = vmatprep.subr.bf16.mxu1 %v4321_v47  ;;  %v258_v47 = vld [vmem:[#allocation5 + $0x4b0] sm:$0xff]  ;;  %v4003_v50 = vcombine.high %v126_v44, %v130_v45  ;;  %v4002_v56 = vcombine.low %v126_v44, %v130_v45 }
 0x104   :  { %2752 = vmatpush2.bf16.msra.mxu0 %v4176_v52  ;;  %v4131_v51 = vcombine.high %v254_v46, %v258_v47  ;;  %v118_v52 = vld [vmem:[#allocation5 + $0x50] sm:$0xff]  ;;  %v4130_v57 = vcombine.low %v254_v46, %v258_v47 }
 0x105   :  { %2821 = vmatprep.subr.bf16.mxu0 %v4369_v54  ;;  %v246_v54 = vld [vmem:[#allocation5 + $0x450] sm:$0xff] }
 0x106   :  { %2791 = vmatpush2.bf16.msra.mxu1 %v4320_v53  ;;  %v122_v53 = vld [vmem:[#allocation5 + $0x70] sm:$0xff] }
 0x107   :  { %2792 = vmatprep.subr.bf16.mxu1 %v4313_v55  ;;  %2754 = vmatmul.mubr.bf16.vlgmr.msra.gmra.mxu0 %v4854_v23  ;;  %v250_v55 = vld [vmem:[#allocation5 + $0x470] sm:$0xff]  ;;  %v3995_v59 = vcombine.high %v118_v52, %v122_v53  ;;  %v3994_v2 = vcombine.low %v118_v52, %v122_v53 }
 0x108   :  { %2822 = vmatpush1.bf16.msra.mxu0 %v4368_v61  ;;  %2839 = vmatprep.mubr.bf16.mxu0 %v4797_v40  ;;  %v4123_v60 = vcombine.high %v246_v54, %v250_v55  ;;  %v110_v61 = vld [vmem:[#allocation5 + $0x10] sm:$0xff]  ;;  %v4122_v3 = vcombine.low %v246_v54, %v250_v55 }
 0x109   :  { %2850 = vmatprep.subr.bf16.mxu0 %v4043_v0  ;;  %v238_v0 = vld [vmem:[#allocation5 + $0x410] sm:$0xff] }
 0x10a   :  { %2793 = vmatpush2.bf16.msra.mxu1 %v4312_v62  ;;  %v114_v62 = vld [vmem:[#allocation5 + $0x30] sm:$0xff] }
 0x10b   :  { %2794 = vmatprep.subr.bf16.mxu1 %v4305_v1  ;;  %v242_v1 = vld [vmem:[#allocation5 + $0x430] sm:$0xff] }
 0x10c   :  { %v230_v6 = vld [vmem:[#allocation5 + $0x3d0] sm:$0xff] }
 0x10d   :  { %v234_v7 = vld [vmem:[#allocation5 + $0x3f0] sm:$0xff] }
 0x10e   :  { %2795 = vmatpush2.bf16.msra.mxu1 %v4304_v4  ;;  %v3987_v4 = vcombine.high %v110_v61, %v114_v62  ;;  %v358_v8 = vld [vmem:[#allocation5 + $0x7d0] sm:$0xff] }
 0x10f   :  { %2893 = vmatprep.subr.bf16.mxu1 %v4171_v5  ;;  %4375 = vmatmul.mubr.msk.bf16.vlgmr.msra.gmra.mxu0 %vm2502_vm0, %v4862_v43  ;;  %v4115_v5 = vcombine.high %v238_v0, %v242_v1  ;;  %v362_v9 = vld [vmem:[#allocation5 + $0x7f0] sm:$0xff] }
 0x110   :  { %2851 = vmatpush1.bf16.msra.mxu0 %v4042_v10  ;;  %2882 = vmatprep.mubr.bf16.mxu0 %v4846_v58  ;;  %v3986_v10 = vcombine.low %v110_v61, %v114_v62  ;;  %v222_v14 = vld [vmem:[#allocation5 + $0x390] sm:$0xff] }
 0x111   :  { %2797 = vmatmul.mubr.bf16.vlgmr.msra.gmra.mxu1 %v4867_v42  ;;  %2852 = vmatprep.subr.bf16.mxu0 %v4035_v12  ;;  %v4107_v12 = vcombine.high %v230_v6, %v234_v7  ;;  %v226_v15 = vld [vmem:[#allocation5 + $0x3b0] sm:$0xff] }
 0x112   :  { %2894 = vmatpush1.bf16.msra.mxu1 %v4170_v11  ;;  %2925 = vmatprep.mubr.bf16.mxu1 %v4848_v63  ;;  %v4114_v11 = vcombine.low %v238_v0, %v242_v1  ;;  %v350_v16 = vld [vmem:[#allocation5 + $0x790] sm:$0xff] }
 0x113   :  { %2895 = vmatprep.subr.bf16.mxu1 %v4163_v13  ;;  %v4235_v13 = vcombine.high %v358_v8, %v362_v9  ;;  %v354_v17 = vld [vmem:[#allocation5 + $0x7b0] sm:$0xff] }
 0x114   :  { %2853 = vmatpush1.bf16.msra.mxu0 %v4034_v18  ;;  %v4106_v18 = vcombine.low %v230_v6, %v234_v7  ;;  %v214_v24 = vld [vmem:[#allocation5 + $0x350] sm:$0xff] }
 0x115   :  { %2854 = vmatprep.subr.bf16.mxu0 %v4027_v21  ;;  %v4099_v21 = vcombine.high %v222_v14, %v226_v15  ;;  %v218_v25 = vld [vmem:[#allocation5 + $0x370] sm:$0xff] }
 0x116   :  { %2896 = vmatpush1.bf16.msra.mxu1 %v4162_v19  ;;  %v4234_v19 = vcombine.low %v358_v8, %v362_v9  ;;  %v342_v26 = vld [vmem:[#allocation5 + $0x750] sm:$0xff] }
 0x117   :  { %2897 = vmatprep.subr.bf16.mxu1 %v4155_v22  ;;  %v4227_v22 = vcombine.high %v350_v16, %v354_v17  ;;  %v346_v27 = vld [vmem:[#allocation5 + $0x770] sm:$0xff] }
 0x118   :  { %2855 = vmatpush1.bf16.msra.mxu0 %v4026_v28  ;;  %v4098_v28 = vcombine.low %v222_v14, %v226_v15  ;;  %v206_v33 = vld [vmem:[#allocation5 + $0x310] sm:$0xff] }
 0x119   :  { %2856 = vmatprep.subr.bf16.mxu0 %v4019_v30  ;;  %v4091_v30 = vcombine.high %v214_v24, %v218_v25  ;;  %v210_v34 = vld [vmem:[#allocation5 + $0x330] sm:$0xff] }
 0x11a   :  { %2898 = vmatpush1.bf16.msra.mxu1 %v4154_v29  ;;  %v4226_v29 = vcombine.low %v350_v16, %v354_v17  ;;  %v334_v35 = vld [vmem:[#allocation5 + $0x710] sm:$0xff] }
 0x11b   :  { %2899 = vmatprep.subr.bf16.mxu1 %v4147_v31  ;;  %v4219_v31 = vcombine.high %v342_v26, %v346_v27  ;;  %v338_v36 = vld [vmem:[#allocation5 + $0x730] sm:$0xff] }
 0x11c   :  { %2857 = vmatpush1.bf16.msra.mxu0 %v4018_v37  ;;  %v4090_v37 = vcombine.low %v214_v24, %v218_v25  ;;  %v198_v44 = vld [vmem:[#allocation5 + $0x2d0] sm:$0xff] }
 0x11d   :  { %2858 = vmatprep.subr.bf16.mxu0 %v4011_v39  ;;  %v4083_v39 = vcombine.high %v206_v33, %v210_v34  ;;  %v202_v45 = vld [vmem:[#allocation5 + $0x2f0] sm:$0xff] }
 0x11e   :  { %2900 = vmatpush1.bf16.msra.mxu1 %v4146_v38  ;;  %v4218_v38 = vcombine.low %v342_v26, %v346_v27  ;;  %v326_v46 = vld [vmem:[#allocation5 + $0x6d0] sm:$0xff]  ;;  %v167_v26 = vld [vmem:[#allocation5 + $0x1d8] sm:$0xff] }
 0x11f   :  { %2901 = vmatprep.subr.bf16.mxu1 %v4139_v41  ;;  %v4211_v41 = vcombine.high %v334_v35, %v338_v36  ;;  %v330_v47 = vld [vmem:[#allocation5 + $0x6f0] sm:$0xff]  ;;  %v171_v27 = vld [vmem:[#allocation5 + $0x1f8] sm:$0xff] }
 0x120   :  { %2859 = vmatpush1.bf16.msra.mxu0 %v4010_v48  ;;  %v4082_v48 = vcombine.low %v206_v33, %v210_v34  ;;  %v190_v52 = vld [vmem:[#allocation5 + $0x290] sm:$0xff] }
 0x121   :  { %2860 = vmatprep.subr.bf16.mxu0 %v4003_v50  ;;  %v4075_v50 = vcombine.high %v198_v44, %v202_v45  ;;  %v194_v53 = vld [vmem:[#allocation5 + $0x2b0] sm:$0xff] }
 0x122   :  { %2902 = vmatpush1.bf16.msra.mxu1 %v4138_v49  ;;  %v4210_v49 = vcombine.low %v334_v35, %v338_v36  ;;  %v318_v54 = vld [vmem:[#allocation5 + $0x690] sm:$0xff] }
 0x123   :  { %2903 = vmatprep.subr.bf16.mxu1 %v4131_v51  ;;  %v4203_v51 = vcombine.high %v326_v46, %v330_v47  ;;  %v322_v55 = vld [vmem:[#allocation5 + $0x6b0] sm:$0xff] }
 0x124   :  { %2861 = vmatpush1.bf16.msra.mxu0 %v4002_v56  ;;  %v4074_v56 = vcombine.low %v198_v44, %v202_v45  ;;  %v182_v61 = vld [vmem:[#allocation5 + $0x250] sm:$0xff]  ;;  %v4044_v45 = vcombine.low %v167_v26, %v171_v27 }
 0x125   :  { %2862 = vmatprep.subr.bf16.mxu0 %v3995_v59  ;;  %v4067_v59 = vcombine.high %v190_v52, %v194_v53  ;;  %v186_v62 = vld [vmem:[#allocation5 + $0x270] sm:$0xff] }
 0x126   :  { %2904 = vmatpush1.bf16.msra.mxu1 %v4130_v57  ;;  %v4202_v57 = vcombine.low %v326_v46, %v330_v47  ;;  %v310_v0 = vld [vmem:[#allocation5 + $0x650] sm:$0xff] }
 0x127   :  { %2905 = vmatprep.subr.bf16.mxu1 %v4123_v60  ;;  %v4195_v60 = vcombine.high %v318_v54, %v322_v55  ;;  %v314_v1 = vld [vmem:[#allocation5 + $0x670] sm:$0xff] }
 0x128   :  { %2863 = vmatpush1.bf16.msra.mxu0 %v3994_v2  ;;  %v4066_v2 = vcombine.low %v190_v52, %v194_v53  ;;  %v174_v6 = vld [vmem:[#allocation5 + $0x210] sm:$0xff] }
 0x129   :  { %2864 = vmatprep.subr.bf16.mxu0 %v3987_v4  ;;  %v4059_v4 = vcombine.high %v182_v61, %v186_v62  ;;  %v178_v7 = vld [vmem:[#allocation5 + $0x230] sm:$0xff] }
 0x12a   :  { %2906 = vmatpush1.bf16.msra.mxu1 %v4122_v3  ;;  %v4194_v3 = vcombine.low %v318_v54, %v322_v55  ;;  %v302_v8 = vld [vmem:[#allocation5 + $0x610] sm:$0xff] }
 0x12b   :  { %2907 = vmatprep.subr.bf16.mxu1 %v4115_v5  ;;  %v4187_v5 = vcombine.high %v310_v0, %v314_v1  ;;  %v306_v9 = vld [vmem:[#allocation5 + $0x630] sm:$0xff] }
 0x12c   :  { %2865 = vmatpush1.bf16.msra.mxu0 %v3986_v10  ;;  %v4058_v10 = vcombine.low %v182_v61, %v186_v62  ;;  %v422_v14 = vld [vmem:[#allocation5 + $0x9d0] sm:$0xff] }
 0x12d   :  { %2866 = vmatprep.subr.bf16.mxu0 %v4107_v12  ;;  %v4051_v12 = vcombine.high %v174_v6, %v178_v7  ;;  %v426_v15 = vld [vmem:[#allocation5 + $0x9f0] sm:$0xff] }
 0x12e   :  { %2908 = vmatpush1.bf16.msra.mxu1 %v4114_v11  ;;  %v4186_v11 = vcombine.low %v310_v0, %v314_v1  ;;  %v494_v16 = vld [vmem:[#allocation5 + $0xc10] sm:$0xff] }
 0x12f   :  { %2909 = vmatprep.subr.bf16.mxu1 %v4235_v13  ;;  %v4179_v13 = vcombine.high %v302_v8, %v306_v9  ;;  %v498_v17 = vld [vmem:[#allocation5 + $0xc30] sm:$0xff] }
 0x130   :  { %2867 = vmatpush2.bf16.msra.mxu0 %v4106_v18  ;;  %v4050_v18 = vcombine.low %v174_v6, %v178_v7  ;;  %v414_v24 = vld [vmem:[#allocation5 + $0x990] sm:$0xff] }
 0x131   :  { %2868 = vmatprep.subr.bf16.mxu0 %v4099_v21  ;;  %v4299_v21 = vcombine.high %v422_v14, %v426_v15  ;;  %v418_v25 = vld [vmem:[#allocation5 + $0x9b0] sm:$0xff] }
 0x132   :  { %2910 = vmatpush2.bf16.msra.mxu1 %v4234_v19  ;;  %v4178_v19 = vcombine.low %v302_v8, %v306_v9  ;;  %v406_v33 = vld [vmem:[#allocation5 + $0x950] sm:$0xff]  ;;  %v4290_v35 = vcombine.low %v414_v24, %v418_v25 }
 0x133   :  { %2911 = vmatprep.subr.bf16.mxu1 %v4227_v22  ;;  %v4371_v22 = vcombine.high %v494_v16, %v498_v17  ;;  %v410_v34 = vld [vmem:[#allocation5 + $0x970] sm:$0xff] }
 0x134   :  { %2869 = vmatpush2.bf16.msra.mxu0 %v4098_v28  ;;  %v4298_v28 = vcombine.low %v422_v14, %v426_v15  ;;  %v4283_v36 = vcombine.high %v406_v33, %v410_v34  ;;  %v4282_v44 = vcombine.low %v406_v33, %v410_v34  ;;  %v366_v9 = vld [vmem:[#allocation5 + $0x810] sm:$0xff] }
 0x135   :  { %2870 = vmatprep.subr.bf16.mxu0 %v4091_v30  ;;  %v4291_v30 = vcombine.high %v414_v24, %v418_v25 }
 0x136   :  { %2912 = vmatpush2.bf16.msra.mxu1 %v4226_v29  ;;  %v4370_v29 = vcombine.low %v494_v16, %v498_v17  ;;  %v486_v17 = vld [vmem:[#allocation5 + $0xbd0] sm:$0xff] }
 0x137   :  { %2913 = vmatprep.subr.bf16.mxu1 %v4219_v31  ;;  %v4045_v31 = vcombine.high %v167_v26, %v171_v27  ;;  %v478_v27 = vld [vmem:[#allocation5 + $0xb90] sm:$0xff] }
 0x138   :  { %2871 = vmatpush2.bf16.msra.mxu0 %v4090_v37  ;;  %v398_v37 = vld [vmem:[#allocation5 + $0x910] sm:$0xff] }
 0x139   :  { %2872 = vmatprep.subr.bf16.mxu0 %v4083_v39  ;;  %v159_v39 = vld [vmem:[#allocation5 + $0x198] sm:$0xff] }
 0x13a   :  { %2914 = vmatpush2.bf16.msra.mxu1 %v4218_v38  ;;  %v402_v38 = vld [vmem:[#allocation5 + $0x930] sm:$0xff] }
 0x13b   :  { %2915 = vmatprep.subr.bf16.mxu1 %v4211_v41  ;;  %v163_v41 = vld [vmem:[#allocation5 + $0x1b8] sm:$0xff]  ;;  %v4275_v46 = vcombine.high %v398_v37, %v402_v38  ;;  %v4274_v52 = vcombine.low %v398_v37, %v402_v38  ;;  %v474_v37 = vld [vmem:[#allocation5 + $0xb70] sm:$0xff] }
 0x13c   :  { %2873 = vmatpush2.bf16.msra.mxu0 %v4082_v48  ;;  %v4037_v47 = vcombine.high %v159_v39, %v163_v41  ;;  %v390_v48 = vld [vmem:[#allocation5 + $0x8d0] sm:$0xff]  ;;  %v4036_v53 = vcombine.low %v159_v39, %v163_v41  ;;  %v231_v38 = vld [vmem:[#allocation5 + $0x3d8] sm:$0xff] }
 0x13d   :  { %2874 = vmatprep.subr.bf16.mxu0 %v4075_v50  ;;  %v151_v50 = vld [vmem:[#allocation5 + $0x158] sm:$0xff] }
 0x13e   :  { %2916 = vmatpush2.bf16.msra.mxu1 %v4210_v49  ;;  %v394_v49 = vld [vmem:[#allocation5 + $0x8f0] sm:$0xff]  ;;  %v235_v39 = vld [vmem:[#allocation5 + $0x3f8] sm:$0xff] }
 0x13f   :  { %2917 = vmatprep.subr.bf16.mxu1 %v4203_v51  ;;  %v155_v51 = vld [vmem:[#allocation5 + $0x178] sm:$0xff]  ;;  %v4267_v54 = vcombine.high %v390_v48, %v394_v49  ;;  %v4266_v61 = vcombine.low %v390_v48, %v394_v49  ;;  %v466_v48 = vld [vmem:[#allocation5 + $0xb30] sm:$0xff] }
 0x140   :  { %2875 = vmatpush2.bf16.msra.mxu0 %v4074_v56  ;;  %v4029_v55 = vcombine.high %v151_v50, %v155_v51  ;;  %v382_v56 = vld [vmem:[#allocation5 + $0x890] sm:$0xff]  ;;  %v4028_v62 = vcombine.low %v151_v50, %v155_v51  ;;  %v223_v49 = vld [vmem:[#allocation5 + $0x398] sm:$0xff] }
 0x141   :  { %2876 = vmatprep.subr.bf16.mxu0 %v4067_v59  ;;  %v143_v59 = vld [vmem:[#allocation5 + $0x118] sm:$0xff] }
 0x142   :  { %2918 = vmatpush2.bf16.msra.mxu1 %v4202_v57  ;;  %v386_v57 = vld [vmem:[#allocation5 + $0x8b0] sm:$0xff]  ;;  %v227_v50 = vld [vmem:[#allocation5 + $0x3b8] sm:$0xff] }
 0x143   :  { %2919 = vmatprep.subr.bf16.mxu1 %v4195_v60  ;;  %v147_v60 = vld [vmem:[#allocation5 + $0x138] sm:$0xff]  ;;  %v4259_v0 = vcombine.high %v382_v56, %v386_v57  ;;  %v4258_v6 = vcombine.low %v382_v56, %v386_v57  ;;  %v458_v56 = vld [vmem:[#allocation5 + $0xaf0] sm:$0xff] }
 0x144   :  { %2877 = vmatpush2.bf16.msra.mxu0 %v4066_v2  ;;  %v4021_v1 = vcombine.high %v143_v59, %v147_v60  ;;  %v374_v2 = vld [vmem:[#allocation5 + $0x850] sm:$0xff]  ;;  %v4020_v7 = vcombine.low %v143_v59, %v147_v60  ;;  %v215_v57 = vld [vmem:[#allocation5 + $0x358] sm:$0xff] }
 0x145   :  { %2878 = vmatprep.subr.bf16.mxu0 %v4059_v4  ;;  %v135_v4 = vld [vmem:[#allocation5 + $0xd8] sm:$0xff] }
 0x146   :  { %2920 = vmatpush2.bf16.msra.mxu1 %v4194_v3  ;;  %v378_v3 = vld [vmem:[#allocation5 + $0x870] sm:$0xff]  ;;  %v219_v59 = vld [vmem:[#allocation5 + $0x378] sm:$0xff] }
 0x147   :  { %2921 = vmatprep.subr.bf16.mxu1 %v4187_v5  ;;  %v139_v5 = vld [vmem:[#allocation5 + $0xf8] sm:$0xff] }
 0x148   :  { %2879 = vmatpush2.bf16.msra.mxu0 %v4058_v10  ;;  %v4013_v8 = vcombine.high %v135_v4, %v139_v5  ;;  %v370_v10 = vld [vmem:[#allocation5 + $0x830] sm:$0xff]  ;;  %v4012_v14 = vcombine.low %v135_v4, %v139_v5  ;;  %v211_v4 = vld [vmem:[#allocation5 + $0x338] sm:$0xff] }
 0x149   :  { %2880 = vmatprep.subr.bf16.mxu0 %v4051_v12  ;;  %v131_v12 = vld [vmem:[#allocation5 + $0xb8] sm:$0xff]  ;;  %v4243_v15 = vcombine.high %v366_v9, %v370_v10 }
 0x14a   :  { %2922 = vmatpush2.bf16.msra.mxu1 %v4186_v11  ;;  %v127_v11 = vld [vmem:[#allocation5 + $0x98] sm:$0xff] }
 0x14b   :  { %2923 = vmatprep.subr.bf16.mxu1 %v4179_v13  ;;  %v4250_v13 = vcombine.low %v374_v2, %v378_v3  ;;  %v4005_v16 = vcombine.high %v127_v11, %v131_v12  ;;  %v4004_v24 = vcombine.low %v127_v11, %v131_v12  ;;  %v203_v11 = vld [vmem:[#allocation5 + $0x2f8] sm:$0xff] }
 0x14c   :  { %2881 = vmatpush2.bf16.msra.mxu0 %v4050_v18  ;;  %v490_v18 = vld [vmem:[#allocation5 + $0xbf0] sm:$0xff] }
 0x14d   :  { %2936 = vmatprep.subr.bf16.mxu0 %v4299_v21  ;;  %v123_v21 = vld [vmem:[#allocation5 + $0x78] sm:$0xff]  ;;  %v4363_v25 = vcombine.high %v486_v17, %v490_v18 }
 0x14e   :  { %2924 = vmatpush2.bf16.msra.mxu1 %v4178_v19  ;;  %v119_v19 = vld [vmem:[#allocation5 + $0x58] sm:$0xff] }
 0x14f   :  { %2993 = vmatprep.subr.bf16.mxu1 %v4371_v22  ;;  %2883 = vmatmul.mubr.bf16.vlgmr.msra.gmra.mxu0 %v4852_v20  ;;  %v4242_v22 = vcombine.low %v366_v9, %v370_v10  ;;  %v3997_v26 = vcombine.high %v119_v19, %v123_v21  ;;  %v3996_v33 = vcombine.low %v119_v19, %v123_v21  ;;  %v442_v9 = vld [vmem:[#allocation5 + $0xa70] sm:$0xff]  ;;  %v199_v10 = vld [vmem:[#allocation5 + $0x2d8] sm:$0xff]  ;;  %v4887_v21 = vpop.f32.mrf.mxu0 }
 0x150   :  { %2937 = vmatpush1.bf16.msra.mxu0 %v4298_v28  ;;  %2968 = vmatprep.mubr.bf16.mxu0 %v4857_v32  ;;  %v482_v28 = vld [vmem:[#allocation5 + $0xbb0] sm:$0xff]  ;;  %v195_v19 = vld [vmem:[#allocation5 + $0x2b8] sm:$0xff] }
 0x151   :  { %2926 = vmatmul.mubr.bf16.vlgmr.msra.gmra.mxu1 %v4854_v23  ;;  %2938 = vmatprep.subr.bf16.mxu0 %v4291_v30  ;;  %v115_v30 = vld [vmem:[#allocation5 + $0x38] sm:$0xff]  ;;  %v4355_v34 = vcombine.high %v478_v27, %v482_v28  ;;  %v4354_v41 = vcombine.low %v478_v27, %v482_v28 }
 0x152   :  { %2994 = vmatpush1.bf16.msra.mxu1 %v4370_v29  ;;  %3011 = vmatprep.mubr.bf16.mxu1 %v4797_v40  ;;  %v111_v29 = vld [vmem:[#allocation5 + $0x18] sm:$0xff] }
 0x153   :  { %3022 = vmatprep.subr.bf16.mxu1 %v4045_v31  ;;  %v4362_v31 = vcombine.low %v486_v17, %v490_v18  ;;  %v434_v17 = vld [vmem:[#allocation5 + $0xa30] sm:$0xff]  ;;  %v191_v18 = vld [vmem:[#allocation5 + $0x298] sm:$0xff] }
 0x154   :  { %2939 = vmatpush1.bf16.msra.mxu0 %v4290_v35  ;;  %v3989_v35 = vcombine.high %v111_v29, %v115_v30  ;;  %v295_v27 = vld [vmem:[#allocation5 + $0x5d8] sm:$0xff] }
 0x155   :  { %2940 = vmatprep.subr.bf16.mxu0 %v4283_v36  ;;  %v470_v36 = vld [vmem:[#allocation5 + $0xb50] sm:$0xff]  ;;  %v299_v28 = vld [vmem:[#allocation5 + $0x5f8] sm:$0xff] }
 0x156   :  { %v4346_v51 = vcombine.low %v470_v36, %v474_v37 }
 0x158   :  { %2941 = vmatpush1.bf16.msra.mxu0 %v4282_v44  ;;  %v3988_v44 = vcombine.low %v111_v29, %v115_v30  ;;  %v183_v29 = vld [vmem:[#allocation5 + $0x258] sm:$0xff] }
 0x159   :  { %4376 = vmatmul.mubr.msk.bf16.vlgmr.msra.gmra.mxu1 %vm2502_vm0, %v4862_v43  ;;  %2942 = vmatprep.subr.bf16.mxu0 %v4275_v46  ;;  %v4109_v46 = vcombine.high %v231_v38, %v235_v39  ;;  %v187_v30 = vld [vmem:[#allocation5 + $0x278] sm:$0xff] }
 0x15a   :  { %3023 = vmatpush1.bf16.msra.mxu1 %v4044_v45  ;;  %3054 = vmatprep.mubr.bf16.mxu1 %v4846_v58  ;;  %v4251_v58 = vcombine.high %v374_v2, %v378_v3  ;;  %v4347_v45 = vcombine.high %v470_v36, %v474_v37  ;;  %v450_v2 = vld [vmem:[#allocation5 + $0xab0] sm:$0xff]  ;;  %v207_v3 = vld [vmem:[#allocation5 + $0x318] sm:$0xff]  ;;  %v4173_v36 = vcombine.high %v295_v27, %v299_v28 }
 0x15b   :  { %3024 = vmatprep.subr.bf16.mxu1 %v4037_v47  ;;  %v462_v47 = vld [vmem:[#allocation5 + $0xb10] sm:$0xff]  ;;  %v4061_v37 = vcombine.high %v183_v29, %v187_v30 }
 0x15c   :  { %2943 = vmatpush1.bf16.msra.mxu0 %v4274_v52  ;;  %v4108_v52 = vcombine.low %v231_v38, %v235_v39  ;;  %v4338_v60 = vcombine.low %v462_v47, %v466_v48  ;;  %v287_v38 = vld [vmem:[#allocation5 + $0x598] sm:$0xff] }
 0x15d   :  { %2944 = vmatprep.subr.bf16.mxu0 %v4267_v54  ;;  %v4101_v54 = vcombine.high %v223_v49, %v227_v50  ;;  %v291_v39 = vld [vmem:[#allocation5 + $0x5b8] sm:$0xff] }
 0x15e   :  { %3025 = vmatpush1.bf16.msra.mxu1 %v4036_v53  ;;  %v4339_v53 = vcombine.high %v462_v47, %v466_v48  ;;  %v4172_v47 = vcombine.low %v295_v27, %v299_v28  ;;  %v4060_v48 = vcombine.low %v183_v29, %v187_v30  ;;  %v259_v27 = vld [vmem:[#allocation5 + $0x4b8] sm:$0xff] }
 0x15f   :  { %3026 = vmatprep.subr.bf16.mxu1 %v4029_v55  ;;  %v454_v55 = vld [vmem:[#allocation5 + $0xad0] sm:$0xff]  ;;  %v399_v29 = vld [vmem:[#allocation5 + $0x918] sm:$0xff] }
 0x160   :  { %2945 = vmatpush1.bf16.msra.mxu0 %v4266_v61  ;;  %v4100_v61 = vcombine.low %v223_v49, %v227_v50  ;;  %v4330_v5 = vcombine.low %v454_v55, %v458_v56  ;;  %v4165_v49 = vcombine.high %v287_v38, %v291_v39  ;;  %v403_v30 = vld [vmem:[#allocation5 + $0x938] sm:$0xff] }
 0x161   :  { %2946 = vmatprep.subr.bf16.mxu0 %v4259_v0  ;;  %v4093_v0 = vcombine.high %v215_v57, %v219_v59 }
 0x162   :  { %3027 = vmatpush1.bf16.msra.mxu1 %v4028_v62  ;;  %v4331_v62 = vcombine.high %v454_v55, %v458_v56  ;;  %v427_v55 = vld [vmem:[#allocation5 + $0x9f8] sm:$0xff] }
 0x163   :  { %3028 = vmatprep.subr.bf16.mxu1 %v4021_v1  ;;  %v446_v1 = vld [vmem:[#allocation5 + $0xa90] sm:$0xff] }
 0x164   :  { %2947 = vmatpush1.bf16.msra.mxu0 %v4258_v6  ;;  %v4092_v6 = vcombine.low %v215_v57, %v219_v59  ;;  %v4322_v12 = vcombine.low %v446_v1, %v450_v2  ;;  %v4164_v59 = vcombine.low %v287_v38, %v291_v39  ;;  %v4277_v39 = vcombine.high %v399_v29, %v403_v30 }
 0x165   :  { %2948 = vmatprep.subr.bf16.mxu0 %v4251_v58  ;;  %v4085_v58 = vcombine.high %v207_v3, %v211_v4 }
 0x166   :  { %3029 = vmatpush1.bf16.msra.mxu1 %v4020_v7  ;;  %v4323_v7 = vcombine.high %v446_v1, %v450_v2  ;;  %v271_v1 = vld [vmem:[#allocation5 + $0x518] sm:$0xff] }
 0x167   :  { %3030 = vmatprep.subr.bf16.mxu1 %v4013_v8  ;;  %v438_v8 = vld [vmem:[#allocation5 + $0xa50] sm:$0xff]  ;;  %v275_v2 = vld [vmem:[#allocation5 + $0x538] sm:$0xff] }
 0x168   :  { %2949 = vmatpush1.bf16.msra.mxu0 %v4250_v13  ;;  %v4084_v13 = vcombine.low %v207_v3, %v211_v4  ;;  %v415_v4 = vld [vmem:[#allocation5 + $0x998] sm:$0xff] }
 0x169   :  { %2950 = vmatprep.subr.bf16.mxu0 %v4243_v15  ;;  %v4077_v15 = vcombine.high %v199_v10, %v203_v11 }
 0x16a   :  { %3031 = vmatpush1.bf16.msra.mxu1 %v4012_v14  ;;  %v4315_v14 = vcombine.high %v438_v8, %v442_v9 }
 0x16b   :  { %3032 = vmatprep.subr.bf16.mxu1 %v4005_v16  ;;  %v430_v16 = vld [vmem:[#allocation5 + $0xa10] sm:$0xff] }
 0x16c   :  { %2951 = vmatpush1.bf16.msra.mxu0 %v4242_v22  ;;  %v4314_v22 = vcombine.low %v438_v8, %v442_v9  ;;  %v4149_v8 = vcombine.high %v271_v1, %v275_v2 }
 0x16d   :  { %2952 = vmatprep.subr.bf16.mxu0 %v4363_v25  ;;  %v4307_v25 = vcombine.high %v430_v16, %v434_v17 }
 0x16e   :  { %3033 = vmatpush1.bf16.msra.mxu1 %v4004_v24  ;;  %v4076_v24 = vcombine.low %v199_v10, %v203_v11  ;;  %v263_v11 = vld [vmem:[#allocation5 + $0x4d8] sm:$0xff] }
 0x16f   :  { %3034 = vmatprep.subr.bf16.mxu1 %v3997_v26  ;;  %v4069_v26 = vcombine.high %v191_v18, %v195_v19 }
 0x170   :  { %2953 = vmatpush2.bf16.msra.mxu0 %v4362_v31  ;;  %v4889_v31 = vpop.f32.mrf.mxu1 }
 0x171   :  { %2954 = vmatprep.subr.bf16.mxu0 %v4355_v34  ;;  %v4306_v34 = vcombine.low %v430_v16, %v434_v17  ;;  %v4148_v17 = vcombine.low %v271_v1, %v275_v2 }
 0x172   :  { %3035 = vmatpush1.bf16.msra.mxu1 %v3996_v33  ;;  %v4891_v33 = vpop.f32.mrf.mxu0 }
 0x173   :  { %3036 = vmatprep.subr.bf16.mxu1 %v3989_v35  ;;  %v4068_v35 = vcombine.low %v191_v18, %v195_v19 }
 0x174   :  { %2955 = vmatpush2.bf16.msra.mxu0 %v4354_v41  ;;  %v175_v41 = vld [vmem:[#allocation5 + $0x218] sm:$0xff] }
 0x175   :  { %2956 = vmatprep.subr.bf16.mxu0 %v4347_v45  ;;  %v4893_v45 = vpop.f32.mrf.mxu1 }
 0x176   :  { %3037 = vmatpush1.bf16.msra.mxu1 %v3988_v44  ;;  %v179_v44 = vld [vmem:[#allocation5 + $0x238] sm:$0xff] }
 0x177   :  { %3038 = vmatprep.subr.bf16.mxu1 %v4109_v46  ;;  %v4895_v46 = vpop.f32.mrf.mxu0  ;;  %v4053_v50 = vcombine.high %v175_v41, %v179_v44  ;;  %v4898_v56 = vpop.f32.mrf.mxu1 }
 0x178   :  { %2957 = vmatpush2.bf16.msra.mxu0 %v4346_v51  ;;  %v279_v51 = vld [vmem:[#allocation5 + $0x558] sm:$0xff] }
 0x179   :  { %2958 = vmatprep.subr.bf16.mxu0 %v4339_v53  ;;  %v502_v53 = vlaneseq  ;;  %v2546_v57 = vpop.f32.mrf.mxu0 }
 0x17a   :  { %3039 = vmatpush2.bf16.msra.mxu1 %v4108_v52  ;;  %v283_v52 = vld [vmem:[#allocation5 + $0x578] sm:$0xff] }
 0x17b   :  { %3040 = vmatprep.subr.bf16.mxu1 %v4101_v54  ;;  %v423_v54 = vld [vmem:[#allocation5 + $0x9d8] sm:$0xff]  ;;  %v4903_v3 = vshrl.u32 %v502_v53, 7 }
 0x17c   :  { %2959 = vmatpush2.bf16.msra.mxu0 %v4338_v60  ;;  %v4052_v60 = vcombine.low %v175_v41, %v179_v44  ;;  %v247_v41 = vld [vmem:[#allocation5 + $0x458] sm:$0xff] }
 0x17d   :  { %2960 = vmatprep.subr.bf16.mxu0 %v4331_v62  ;;  %v251_v44 = vld [vmem:[#allocation5 + $0x478] sm:$0xff] }
 0x17e   :  { %3041 = vmatpush2.bf16.msra.mxu1 %v4100_v61  ;;  %v4157_v61 = vcombine.high %v279_v51, %v283_v52  ;;  %v4125_v53 = vcombine.high %v247_v41, %v251_v44  ;;  %v4124_v1 = vcombine.low %v247_v41, %v251_v44  ;;  %v339_v41 = vld [vmem:[#allocation5 + $0x738] sm:$0xff]  ;;  %v504_v44 = vsub.s32 0, %v4903_v3 }
 0x17f   :  { %3042 = vmatprep.subr.bf16.mxu1 %v4093_v0  ;;  %v4301_v0 = vcombine.high %v423_v54, %v427_v55 }
 0x180   :  { %2961 = vmatpush2.bf16.msra.mxu0 %v4330_v5  ;;  %v419_v5 = vld [vmem:[#allocation5 + $0x9b8] sm:$0xff] }
 0x181   :  { %2962 = vmatprep.subr.bf16.mxu0 %v4323_v7  ;;  %v4156_v7 = vcombine.low %v279_v51, %v283_v52  ;;  %v4293_v10 = vcombine.high %v415_v4, %v419_v5  ;;  %v4292_v19 = vcombine.low %v415_v4, %v419_v5 }
 0x182   :  { %3043 = vmatpush2.bf16.msra.mxu1 %v4092_v6  ;;  %v2589_v6 = vpop.f32.mrf.mxu1 }
 0x183   :  { %3044 = vmatprep.subr.bf16.mxu1 %v4085_v58  ;;  %v508_v58 = vsub.s32 1, %v4903_v3 }
 0x184   :  { %2963 = vmatpush2.bf16.msra.mxu0 %v4322_v12  ;;  %v267_v12 = vld [vmem:[#allocation5 + $0x4f8] sm:$0xff]  ;;  %v4908_v16 = vpop.f32.mrf.mxu1 }
 0x185   :  { %2964 = vmatprep.subr.bf16.mxu0 %v4315_v14  ;;  %v411_v14 = vld [vmem:[#allocation5 + $0x978] sm:$0xff] }
 0x186   :  { %3045 = vmatpush2.bf16.msra.mxu1 %v4084_v13  ;;  %v407_v13 = vld [vmem:[#allocation5 + $0x958] sm:$0xff] }
 0x187   :  { %3046 = vmatprep.subr.bf16.mxu1 %v4077_v15  ;;  %v4901_v62 = vpop.f32.mrf.mxu0  ;;  %v4906_v15 = vld [vmem:[#allocation7] sm:$0xff] }
 0x188   :  { %2965 = vmatpush2.bf16.msra.mxu0 %v4314_v22  ;;  %v509_v18 = vrot.slane %v4906_v15, %v508_v58  ;;  %v4141_v22 = vcombine.high %v263_v11, %v267_v12 }
 0x189   :  { %2966 = vmatprep.subr.bf16.mxu0 %v4307_v25  ;;  %v2628_v9 = vpop.f32.mrf.mxu0  ;;  %v4285_v25 = vcombine.high %v407_v13, %v411_v14 }
 0x18a   :  { %3047 = vmatpush2.bf16.msra.mxu1 %v4076_v24  ;;  %v2547_v28 = vadd.f32 %v2546_v57, %v509_v18  ;;  %v243_v57 = vld [vmem:[#allocation5 + $0x438] sm:$0xff] }
 0x18b   :  { %3048 = vmatprep.subr.bf16.mxu1 %v4069_v26  ;;  %v4912_v24 = vpop.f32.mrf.mxu0  ;;  %v255_v26 = vld [vmem:[#allocation5 + $0x498] sm:$0xff] }
 0x18c   :  { %2967 = vmatpush2.bf16.msra.mxu0 %v4306_v34  ;;  %v4140_v34 = vcombine.low %v263_v11, %v267_v12  ;;  %v4132_v51 = vcombine.low %v255_v26, %v259_v27 }
 0x18d   :  { %3065 = vmatprep.subr.bf16.mxu0 %v4173_v36  ;;  %v4284_v36 = vcombine.low %v407_v13, %v411_v14  ;;  %v2632_v38 = vpop.f32.mrf.mxu0  ;;  %v351_v14 = vld [vmem:[#allocation5 + $0x798] sm:$0xff] }
 0x18e   :  { %3049 = vmatpush2.bf16.msra.mxu1 %v4068_v35  ;;  %v2543_v35 = vadd.f32 %v4891_v33, %v509_v18  ;;  %v367_v18 = vld [vmem:[#allocation5 + $0x818] sm:$0xff] }
 0x18f   :  { %3050 = vmatprep.subr.bf16.mxu1 %v4061_v37  ;;  %2969 = vmatmul.mubr.bf16.vlgmr.msra.gmra.mxu0 %v4867_v42  ;;  %v4133_v37 = vcombine.high %v255_v26, %v259_v27 }
 0x190   :  { %3066 = vmatpush1.bf16.msra.mxu0 %v4172_v47  ;;  %3097 = vmatprep.mubr.bf16.mxu0 %v4848_v63  ;;  %v4300_v63 = vcombine.low %v423_v54, %v427_v55  ;;  %v2590_v47 = vadd.f32 %v2589_v6, %v2547_v28  ;;  %v2586_v52 = vadd.f32 %v4893_v45, %v2543_v35  ;;  %v239_v55 = vld [vmem:[#allocation5 + $0x418] sm:$0xff] }
 0x191   :  { %3067 = vmatprep.subr.bf16.mxu0 %v4165_v49  ;;  %v4117_v5 = vcombine.high %v239_v55, %v243_v57  ;;  %v359_v6 = vld [vmem:[#allocation5 + $0x7d8] sm:$0xff] }
 0x192   :  { %3051 = vmatpush2.bf16.msra.mxu1 %v4060_v48  ;;  %v391_v48 = vld [vmem:[#allocation5 + $0x8d8] sm:$0xff]  ;;  %v2633_v33 = vadd.f32 %v2632_v38, %v2590_v47 }
 0x193   :  { %3052 = vmatprep.subr.bf16.mxu1 %v4053_v50  ;;  %v4276_v50 = vcombine.low %v399_v29, %v403_v30  ;;  %v343_v29 = vld [vmem:[#allocation5 + $0x758] sm:$0xff] }
 0x194   :  { %3068 = vmatpush1.bf16.msra.mxu0 %v4164_v59  ;;  %v2629_v59 = vadd.f32 %v2628_v9, %v2586_v52  ;;  %v347_v30 = vld [vmem:[#allocation5 + $0x778] sm:$0xff] }
 0x195   :  { %3069 = vmatprep.subr.bf16.mxu0 %v4157_v61  ;;  %v387_v61 = vld [vmem:[#allocation5 + $0x8b8] sm:$0xff] }
 0x196   :  { %3053 = vmatpush2.bf16.msra.mxu1 %v4052_v60  ;;  %v383_v60 = vld [vmem:[#allocation5 + $0x898] sm:$0xff] }
 0x197   :  { %3108 = vmatprep.subr.bf16.mxu1 %v4301_v0  ;;  %v4261_v45 = vcombine.high %v383_v60, %v387_v61  ;;  %v4260_v11 = vcombine.low %v383_v60, %v387_v61  ;;  %v479_v47 = vld [vmem:[#allocation5 + $0xb98] sm:$0xff] }
 0x198   :  { %3070 = vmatpush1.bf16.msra.mxu0 %v4156_v7  ;;  %v363_v7 = vld [vmem:[#allocation5 + $0x7f8] sm:$0xff] }
 0x199   :  { %3055 = vmatmul.mubr.bf16.vlgmr.msra.gmra.mxu1 %v4852_v20  ;;  %3071 = vmatprep.subr.bf16.mxu0 %v4149_v8  ;;  %v2671_v20 = vpop.f32.mrf.mxu1  ;;  %v379_v8 = vld [vmem:[#allocation5 + $0x878] sm:$0xff]  ;;  %v4237_v12 = vcombine.high %v359_v6, %v363_v7 }
 0x19a   :  { %3109 = vmatpush1.bf16.msra.mxu1 %v4300_v63  ;;  %3140 = vmatprep.mubr.bf16.mxu1 %v4857_v32  ;;  %v395_v32 = vld [vmem:[#allocation5 + $0x8f8] sm:$0xff]  ;;  %v2672_v58 = vadd.f32 %v2671_v20, %v2629_v59 }
 0x19b   :  { %3110 = vmatprep.subr.bf16.mxu1 %v4293_v10  ;;  %v4916_v49 = vpop.f32.mrf.mxu1  ;;  %v4269_v54 = vcombine.high %v391_v48, %v395_v32  ;;  %v4268_v4 = vcombine.low %v391_v48, %v395_v32  ;;  %v375_v63 = vld [vmem:[#allocation5 + $0x858] sm:$0xff]  ;;  %v4116_v10 = vcombine.low %v239_v55, %v243_v57  ;;  %v4220_v32 = vcombine.low %v343_v29, %v347_v30 }
 0x19c   :  { %3072 = vmatpush1.bf16.msra.mxu0 %v4148_v17  ;;  %v4253_v13 = vcombine.high %v375_v63, %v379_v8  ;;  %v355_v17 = vld [vmem:[#allocation5 + $0x7b8] sm:$0xff]  ;;  %v4252_v26 = vcombine.low %v375_v63, %v379_v8 }
 0x19d   :  { %3073 = vmatprep.subr.bf16.mxu0 %v4141_v22  ;;  %v2675_v0 = vpop.f32.mrf.mxu1  ;;  %v4236_v22 = vcombine.low %v359_v6, %v363_v7  ;;  %v4229_v27 = vcombine.high %v351_v14, %v355_v17  ;;  %v487_v20 = vld [vmem:[#allocation5 + $0xbd8] sm:$0xff]  ;;  %v4228_v35 = vcombine.low %v351_v14, %v355_v17 }
 0x19e   :  { %3111 = vmatpush1.bf16.msra.mxu1 %v4292_v19  ;;  %v2676_v2 = vadd.f32 %v2675_v0, %v2633_v33  ;;  %v371_v19 = vld [vmem:[#allocation5 + $0x838] sm:$0xff] }
 0x19f   :  { %3112 = vmatprep.subr.bf16.mxu1 %v4285_v25  ;;  %v4245_v28 = vcombine.high %v367_v18, %v371_v19  ;;  %v483_v48 = vld [vmem:[#allocation5 + $0xbb8] sm:$0xff] }
 0x1a0   :  { %3074 = vmatpush1.bf16.msra.mxu0 %v4140_v34  ;;  %v3195_v9 = vpack.c.bf16 %v2676_v2, %v2672_v58  ;;  %v491_v34 = vld [vmem:[#allocation5 + $0xbf8] sm:$0xff]  ;;  %v4357_v52 = vcombine.high %v479_v47, %v483_v48  ;;  %v4356_v61 = vcombine.low %v479_v47, %v483_v48 }
 0x1a1   :  { %3075 = vmatprep.subr.bf16.mxu0 %v4133_v37  ;;  %v4221_v37 = vcombine.high %v343_v29, %v347_v30  ;;  %v4365_v38 = vcombine.high %v487_v20, %v491_v34  ;;  %v327_v33 = vld [vmem:[#allocation5 + $0x6d8] sm:$0xff] }
 0x1a2   :  { %3113 = vmatpush1.bf16.msra.mxu1 %v4284_v36  ;;  %v4379_v25 = vmul.bf16 3216621497, %v3195_v9  ;;  %v4244_v36 = vcombine.low %v367_v18, %v371_v19  ;;  %v471_v55 = vld [vmem:[#allocation5 + $0xb58] sm:$0xff] }
 0x1a3   :  { %3114 = vmatprep.subr.bf16.mxu1 %v4277_v39  ;;  %v335_v39 = vld [vmem:[#allocation5 + $0x718] sm:$0xff] }
 0x1a4   :  { %3076 = vmatpush1.bf16.msra.mxu0 %v4132_v51  ;;  %4618 = vpow.bf16 %v4379_v25  ;;  %v4213_v51 = vcombine.high %v335_v39, %v339_v41  ;;  %v475_v57 = vld [vmem:[#allocation5 + $0xb78] sm:$0xff]  ;;  %v4212_v59 = vcombine.low %v335_v39, %v339_v41  ;;  %v512_v41 = vsub.s32 2, %v4903_v3 }
 0x1a5   :  { %3077 = vmatprep.subr.bf16.mxu0 %v4125_v53  ;;  %v331_v53 = vld [vmem:[#allocation5 + $0x6f8] sm:$0xff]  ;;  %v4348_v63 = vcombine.low %v471_v55, %v475_v57 }
 0x1a6   :  { %3115 = vmatpush1.bf16.msra.mxu1 %v4276_v50  ;;  %v4364_v50 = vcombine.low %v487_v20, %v491_v34  ;;  %v4205_v0 = vcombine.high %v327_v33, %v331_v53  ;;  %v319_v2 = vld [vmem:[#allocation5 + $0x698] sm:$0xff]  ;;  %v4204_v7 = vcombine.low %v327_v33, %v331_v53 }
 0x1a7   :  { %3116 = vmatprep.subr.bf16.mxu1 %v4269_v54  ;;  %v505_v54 = vrot.slane %v4906_v15, %v504_v44  ;;  %v467_v6 = vld [vmem:[#allocation5 + $0xb38] sm:$0xff] }
 0x1a8   :  { %3078 = vmatpush1.bf16.msra.mxu0 %v4124_v1  ;;  %v4349_v1 = vcombine.high %v471_v55, %v475_v57  ;;  %v315_v9 = vld [vmem:[#allocation5 + $0x678] sm:$0xff] }
 0x1a9   :  { %3079 = vmatprep.subr.bf16.mxu0 %v4117_v5  ;;  %v2545_v60 = vadd.f32 %v4895_v46, %v505_v54  ;;  %v2541_v5 = vadd.f32 %v4887_v21, %v505_v54  ;;  %v455_v21 = vld [vmem:[#allocation5 + $0xad8] sm:$0xff]  ;;  %v513_v54 = vrot.slane %v4906_v15, %v512_v41 }
 0x1aa   :  { %3117 = vmatpush1.bf16.msra.mxu1 %v4268_v4  ;;  %v323_v4 = vld [vmem:[#allocation5 + $0x6b8] sm:$0xff] }
 0x1ab   :  { %3118 = vmatprep.subr.bf16.mxu1 %v4261_v45  ;;  %v463_v45 = vld [vmem:[#allocation5 + $0xb18] sm:$0xff]  ;;  %v2588_v58 = vadd.f32 %v4898_v56, %v2545_v60  ;;  %v4197_v46 = vcombine.high %v319_v2, %v323_v4  ;;  %v4196_v17 = vcombine.low %v319_v2, %v323_v4  ;;  %v4554_v2 = vld [vmem:[#allocation8 + $0x78] sm:$0xff]  }
 0x1ac   :  { %3080 = vmatpush1.bf16.msra.mxu0 %v4116_v10  ;;  %v4341_v8 = vcombine.high %v463_v45, %v467_v6  ;;  %v311_v10 = vld [vmem:[#allocation5 + $0x658] sm:$0xff]  ;;  %v4340_v56 = vcombine.low %v463_v45, %v467_v6 }
 0x1ad   :  { %3081 = vmatprep.subr.bf16.mxu0 %v4237_v12  ;;  %v2584_v12 = vadd.f32 %v4889_v31, %v2541_v5  ;;  %v459_v14 = vld [vmem:[#allocation5 + $0xaf8] sm:$0xff]  ;;  %v4189_v19 = vcombine.high %v311_v10, %v315_v9  ;;  %v4188_v30 = vcombine.low %v311_v10, %v315_v9 }
 0x1ae   :  { %3119 = vmatpush1.bf16.msra.mxu1 %v4260_v11  ;;  %v4333_v25 = vcombine.high %v455_v21, %v459_v14  ;;  %v447_v29 = vld [vmem:[#allocation5 + $0xa98] sm:$0xff] }
 0x1af   :  { %3120 = vmatprep.subr.bf16.mxu1 %v4253_v13  ;;  %v2631_v13 = vadd.f32 %v4912_v24, %v2588_v58  ;;  %v2627_v18 = vadd.f32 %v4901_v62, %v2584_v12  ;;  %v451_v24 = vld [vmem:[#allocation5 + $0xab8] sm:$0xff]  ;;  %v4332_v62 = vcombine.low %v455_v21, %v459_v14 }
 0x1b0   :  { %3082 = vmatpush2.bf16.msra.mxu0 %v4236_v22  ;;  %v2712_v22 = vpop.f32.mrf.mxu1  ;;  %v439_v44 = vld [vmem:[#allocation5 + $0xa58] sm:$0xff] }
 0x1b1   :  { %3083 = vmatprep.subr.bf16.mxu0 %v4229_v27  ;;  %v307_v27 = vld [vmem:[#allocation5 + $0x638] sm:$0xff]  ;;  %v2674_v31 = vadd.f32 %v4916_v49, %v2631_v13  ;;  %v2670_v20 = vadd.f32 %v4908_v16, %v2627_v18  ;;  %v516_v16 = vsub.s32 3, %v4903_v3  ;;  %v2713_v45 = vadd.f32 %v2712_v22, %v513_v54 }
 0x1b2   :  { %3121 = vmatpush1.bf16.msra.mxu1 %v4252_v26  ;;  %v4619_v11 = vpop.eup %4618  ;;  %v303_v26 = vld [vmem:[#allocation5 + $0x618] sm:$0xff] }
 0x1b3   :  { %3122 = vmatprep.subr.bf16.mxu1 %v4245_v28  ;;  %v3235_v28 = vadd.bf16 1065369472, %v4619_v11  ;;  %v4181_v34 = vcombine.high %v303_v26, %v307_v27  ;;  %v3194_v39 = vpack.c.bf16 %v2674_v31, %v2670_v20  ;;  %v443_v47 = vld [vmem:[#allocation5 + $0xa78] sm:$0xff]  ;;  %v4180_v48 = vcombine.low %v303_v26, %v307_v27  ;;  %v4560_v11 = vld [vmem:[#allocation8 + $0xf8] sm:$0xff]  }
 0x1b4   :  { %3084 = vmatpush2.bf16.msra.mxu0 %v4228_v35  ;;  %v2714_v35 = vpop.f32.mrf.mxu1  ;;  %v4317_v33 = vcombine.high %v439_v44, %v443_v47  ;;  %v431_v57 = vld [vmem:[#allocation5 + $0xa18] sm:$0xff] }
 0x1b5   :  { %3085 = vmatprep.subr.bf16.mxu0 %v4221_v37  ;;  %v495_v37 = vld [vmem:[#allocation5 + $0xc18] sm:$0xff]  ;;  %4620 = vrcp.bf16 %v3235_v28  ;;  %v4378_v53 = vmul.bf16 3216621497, %v3194_v39  ;;  %v4562_v28 = vld [vmem:[#allocation8 + $0xb8] sm:$0xff]  }
 0x1b6   :  { %3123 = vmatpush1.bf16.msra.mxu1 %v4244_v36  ;;  %v4325_v36 = vcombine.high %v447_v29, %v451_v24  ;;  %v4564_v20 = vld [vmem:[#allocation8 + $0xf0] sm:$0xff]  }
 0x1b7   :  { %3124 = vmatprep.subr.bf16.mxu1 %v4365_v38  ;;  %v499_v38 = vld [vmem:[#allocation5 + $0xc38] sm:$0xff]  ;;  %4622 = vpow.bf16 %v4378_v53  ;;  %v4567_v53 = vld [vmem:[#allocation8 + $0x18] sm:$0xff]  }
 0x1b8   :  { %3086 = vmatpush2.bf16.msra.mxu0 %v4220_v32  ;;  %v4372_v60 = vcombine.low %v495_v37, %v499_v38 }
 0x1b9   :  { %3087 = vmatprep.subr.bf16.mxu0 %v4213_v51  ;;  %v4373_v51 = vcombine.high %v495_v37, %v499_v38  ;;  %v4558_v37 = vld [vmem:[#allocation8 + $0x68] sm:$0xff]   ;;  %v4566_v38 = vld [vmem:[#allocation8 + $0xb0] sm:$0xff]  }
 0x1ba   :  { %3125 = vmatpush2.bf16.msra.mxu1 %v4364_v50  ;;  %v4324_v50 = vcombine.low %v447_v29, %v451_v24 }
 0x1bb   :  { %3126 = vmatprep.subr.bf16.mxu1 %v4357_v52  ;;  %v2716_v52 = vpop.f32.mrf.mxu1 }
 0x1bc   :  { %3088 = vmatpush2.bf16.msra.mxu0 %v4212_v59  ;;  %v435_v59 = vld [vmem:[#allocation5 + $0xa38] sm:$0xff] }
 0x1bd   :  { %3089 = vmatprep.subr.bf16.mxu0 %v4205_v0  ;;  %v2718_v4 = vpop.f32.mrf.mxu1  ;;  %v4309_v5 = vcombine.high %v431_v57, %v435_v59  ;;  %v4308_v58 = vcombine.low %v431_v57, %v435_v59  ;;  %v4580_v57 = vld [vmem:[#allocation8 + $0xd0] sm:$0xff]  }
 0x1be   :  { %3127 = vmatpush2.bf16.msra.mxu1 %v4356_v61  ;;  %v517_v61 = vrot.slane %v4906_v15, %v516_v16  ;;  %v4572_v16 = vld [vmem:[#allocation8 + $0xe0] sm:$0xff]   ;;  %v4571_v59 = vld [vmem:[#allocation8 + $0x10] sm:$0xff]  }
 0x1bf   :  { %3128 = vmatprep.subr.bf16.mxu1 %v4349_v1  ;;  %v4316_v1 = vcombine.low %v439_v44, %v443_v47 }
 0x1c0   :  { %3090 = vmatpush2.bf16.msra.mxu0 %v4204_v7  ;;  %v2719_v12 = vadd.f32 %v2718_v4, %v517_v61  ;;  %v4575_v4 = vld [vmem:[#allocation8 + $0x8] sm:$0xff]  }
 0x1c1   :  { %3091 = vmatprep.subr.bf16.mxu0 %v4197_v46  ;;  %v2717_v46 = vadd.f32 %v2716_v52, %v513_v54  ;;  %v4574_v52 = vld [vmem:[#allocation8 + $0xa0] sm:$0xff]   ;;  %v4569_v54 = vld [vmem:[#allocation8 + $0x50] sm:$0xff]  }
 0x1c2   :  { %3129 = vmatpush2.bf16.msra.mxu1 %v4348_v63  ;;  %v2715_v63 = vadd.f32 %v2714_v35, %v517_v61  ;;  %v4581_v61 = vld [vmem:[#allocation8 + $0x90] sm:$0xff]  }
 0x1c3   :  { %3130 = vmatprep.subr.bf16.mxu1 %v4341_v8 }
 0x1c4   :  { %3092 = vmatpush2.bf16.msra.mxu0 %v4196_v17  ;;  %v4621_v17 = vpop.eup %4620 }
 0x1c5   :  { %3093 = vmatprep.subr.bf16.mxu0 %v4189_v19  ;;  %v4623_v44 = vpop.eup %4622 }
 0x1c6   :  { %3131 = vmatpush2.bf16.msra.mxu1 %v4340_v56  ;;  %v4555_v56 = vld [vmem:[#allocation8 + $0x38] sm:$0xff]  }
 0x1c7   :  { %3132 = vmatprep.subr.bf16.mxu1 %v4333_v25  ;;  %v2755_v49 = vpop.f32.mrf.mxu0  ;;  %v4556_v25 = vld [vmem:[#allocation8 + $0x70] sm:$0xff]  }
 0x1c8   :  { %3094 = vmatpush2.bf16.msra.mxu0 %v4188_v30  ;;  %v2756_v8 = vadd.f32 %v2755_v49, %v2713_v45  ;;  %v3245_v30 = vmul.bf16 1065369472, %v4621_v17  ;;  %v4568_v49 = vld [vmem:[#allocation8 + $0xe8] sm:$0xff]   ;;  %v4577_v45 = vld [vmem:[#allocation8 + $0x40] sm:$0xff]  }
 0x1c9   :  { %v2757_v32 = vpop.f32.mrf.mxu0  ;;  %3095 = vmatprep.subr.bf16.mxu0 %v4181_v34  ;;  %v4592_v17 = vld [vmem:[#allocation8 + $0x160] sm:$0xff]  }
 0x1ca   :  { %3133 = vmatpush2.bf16.msra.mxu1 %v4332_v62  ;;  %v2758_v13 = vadd.f32 %v2757_v32, %v2715_v63  ;;  %v4557_v62 = vld [vmem:[#allocation8 + $0x30] sm:$0xff]   ;;  %v3234_v32 = vadd.bf16 1065369472, %v4623_v44  ;;  %v4579_v63 = vld [vmem:[#allocation8] sm:$0xff]  }
 0x1cb   :  { %3134 = vmatprep.subr.bf16.mxu1 %v4325_v36  ;;  %v2759_v55 = vpop.f32.mrf.mxu0  ;;  %v4613_v44 = vld [vmem:[#allocation8 + $0x190] sm:$0xff]  }
 0x1cc   :  { %3096 = vmatpush2.bf16.msra.mxu0 %v4180_v48  ;;  %v2760_v21 = vadd.f32 %v2759_v55, %v2717_v46  ;;  %v4570_v48 = vld [vmem:[#allocation8 + $0xa8] sm:$0xff]   ;;  %v4578_v55 = vld [vmem:[#allocation8 + $0x98] sm:$0xff]  }
 0x1cd   :  { %v2761_v0 = vpop.f32.mrf.mxu0  ;;  %3165 = vmatprep.subr.bf16.mxu0 %v4373_v51  ;;  %v4565_v51 = vld [vmem:[#allocation8 + $0x58] sm:$0xff]  }
 0x1ce   :  { %3135 = vmatpush2.bf16.msra.mxu1 %v4324_v50  ;;  %v2762_v19 = vadd.f32 %v2761_v0, %v2719_v12  ;;  %v4563_v50 = vld [vmem:[#allocation8 + $0x20] sm:$0xff]   ;;  %v4586_v46 = vld [vmem:[#allocation8 + $0x178] sm:$0xff]   ;;  %v4588_v12 = vld [vmem:[#allocation8 + $0x170] sm:$0xff]  }
 0x1cf   :  { %3136 = vmatprep.subr.bf16.mxu1 %v4317_v33  ;;  %3098 = vmatmul.mubr.bf16.vlgmr.msra.gmra.mxu0 %v4854_v23  ;;  %v2841_v6 = vpop.f32.mrf.mxu0  ;;  %v4576_v33 = vld [vmem:[#allocation8 + $0xd8] sm:$0xff]  }
 0x1d0   :  { %3166 = vmatpush1.bf16.msra.mxu0 %v4372_v60  ;;  %3183 = vmatprep.mubr.bf16.mxu0 %v4797_v40  ;;  %v4573_v60 = vld [vmem:[#allocation8 + $0x48] sm:$0xff]  }
 0x1d1   :  { %v2798_v7 = vpop.f32.mrf.mxu1  ;;  %v2843_v10 = vpop.f32.mrf.mxu0  ;;  %4451 = vmatprep.subr.bf16.mxu0 %v4554_v2 }
 0x1d2   :  { %3137 = vmatpush2.bf16.msra.mxu1 %v4316_v1  ;;  %v2799_v14 = vadd.f32 %v2798_v7, %v2756_v8  ;;  %v4582_v1 = vld [vmem:[#allocation8 + $0xc8] sm:$0xff]  }
 0x1d3   :  { %v2800_v9 = vpop.f32.mrf.mxu1  ;;  %3138 = vmatprep.subr.bf16.mxu1 %v4309_v5  ;;  %v2845_v23 = vpop.f32.mrf.mxu0  ;;  %v4583_v7 = vld [vmem:[#allocation8 + $0x88] sm:$0xff]  }
 0x1d4   :  { %v2801_v22 = vadd.f32 %v2800_v9, %v2758_v13  ;;  %v2842_v31 = vadd.f32 %v2841_v6, %v2799_v14  ;;  %v4587_v9 = vld [vmem:[#allocation8 + $0x138] sm:$0xff]   ;;  %v4589_v13 = vld [vmem:[#allocation8 + $0x130] sm:$0xff]   ;;  %v4591_v14 = vld [vmem:[#allocation8 + $0x128] sm:$0xff]  }
 0x1d5   :  { %v2802_v18 = vpop.f32.mrf.mxu1  ;;  %v2847_v27 = vpop.f32.mrf.mxu0 }
 0x1d6   :  { %v2803_v40 = vadd.f32 %v2802_v18, %v2760_v21  ;;  %3139 = vmatpush2.bf16.msra.mxu1 %v4308_v58  ;;  %v2844_v34 = vadd.f32 %v2843_v10, %v2801_v22  ;;  %v4584_v58 = vld [vmem:[#allocation8 + $0xc0] sm:$0xff]   ;;  %v4590_v21 = vld [vmem:[#allocation8 + $0x168] sm:$0xff]  }
 0x1d7   :  { %v2804_v26 = vpop.f32.mrf.mxu1  ;;  %4473 = vmatprep.subr.bf16.mxu1 %v4560_v11  ;;  %4377 = vmatmul.mubr.msk.bf16.vlgmr.msra.gmra.mxu0 %vm2502_vm0, %v4862_v43  ;;  %v4559_v43 = vld [vmem:[#allocation8 + $0x28] sm:$0xff]   ;;  %v4585_v10 = vld [vmem:[#allocation8 + $0x80] sm:$0xff]  }
 0x1d8   :  { %v2846_v29 = vadd.f32 %v2845_v23, %v2803_v40  ;;  %v2805_v24 = vadd.f32 %v2804_v26, %v2762_v19  ;;  %4452 = vmatpush3.bf16.msra.mxu0 %v4555_v56  ;;  %3809 = vmatprep.mubr.bf16.mxu0 %v3245_v30  ;;  %v4593_v22 = vld [vmem:[#allocation8 + $0x120] sm:$0xff]   ;;  %v4594_v40 = vld [vmem:[#allocation8 + $0x158] sm:$0xff]   ;;  %v4596_v26 = vld [vmem:[#allocation8 + $0x150] sm:$0xff]  }
 0x1d9   :  { %3141 = vmatmul.mubr.bf16.vlgmr.msra.gmra.mxu1 %v4867_v42  ;;  %4453 = vmatprep.subr.bf16.mxu0 %v4556_v25  ;;  %v4561_v42 = vld [vmem:[#allocation8 + $0x60] sm:$0xff]   ;;  %v4595_v25 = vld [vmem:[#allocation8 + $0x118] sm:$0xff]  }
 0x1da   :  { %v3196_v35 = vpack.c.bf16 %v2846_v29, %v2842_v31  ;;  %v2848_v36 = vadd.f32 %v2847_v27, %v2805_v24  ;;  %4474 = vmatpush3.bf16.msra.mxu1 %v4562_v28  ;;  %v4597_v27 = vld [vmem:[#allocation8 + $0x110] sm:$0xff]   ;;  %v4598_v28 = vld [vmem:[#allocation8 + $0x148] sm:$0xff]   ;;  %v4600_v29 = vld [vmem:[#allocation8 + $0x140] sm:$0xff]  }
 0x1db   :  { %4475 = vmatprep.subr.bf16.mxu1 %v4564_v20  ;;  %v4599_v31 = vld [vmem:[#allocation8 + $0x108] sm:$0xff]   ;;  %v4601_v24 = vld [vmem:[#allocation8 + $0x100] sm:$0xff]   ;;  %v4602_v30 = vld [vmem:[#allocation8 + $0x1f8] sm:$0xff]  }
 0x1dc   :  { %v4380_v39 = vmul.bf16 3216621497, %v3196_v35  ;;  %v3197_v41 = vpack.c.bf16 %v2848_v36, %v2844_v34  ;;  %4454 = vmatpush3.bf16.msra.mxu0 %v4557_v62  ;;  %v4603_v20 = vld [vmem:[#allocation8 + $0x1b8] sm:$0xff]   ;;  %v4604_v62 = vld [vmem:[#allocation8 + $0x1f0] sm:$0xff]   ;;  %v4606_v35 = vld [vmem:[#allocation8 + $0x1e8] sm:$0xff]  }
 0x1dd   :  { %4455 = vmatprep.subr.bf16.mxu0 %v4558_v37  ;;  %v4605_v34 = vld [vmem:[#allocation8 + $0x1b0] sm:$0xff]   ;;  %v4607_v36 = vld [vmem:[#allocation8 + $0x1a8] sm:$0xff]   ;;  %v4608_v37 = vld [vmem:[#allocation8 + $0x1e0] sm:$0xff]  }
 0x1de   :  { %4624 = vpow.bf16 %v4380_v39  ;;  %v4381_v47 = vmul.bf16 3216621497, %v3197_v41  ;;  %4476 = vmatpush3.bf16.msra.mxu1 %v4566_v38  ;;  %v4609_v38 = vld [vmem:[#allocation8 + $0x1a0] sm:$0xff]   ;;  %v4610_v39 = vld [vmem:[#allocation8 + $0x1d8] sm:$0xff]  }
 0x1df   :  { %4477 = vmatprep.subr.bf16.mxu1 %v4568_v49  ;;  %v4611_v41 = vld [vmem:[#allocation8 + $0x198] sm:$0xff]  }
 0x1e0   :  { %4626 = vpow.bf16 %v4381_v47  ;;  %4456 = vmatpush3.bf16.msra.mxu0 %v4559_v43  ;;  %v4612_v43 = vld [vmem:[#allocation8 + $0x1d0] sm:$0xff]  }
 0x1e1   :  { %4457 = vmatprep.subr.bf16.mxu0 %v4561_v42  ;;  %4628 = vrcp.bf16 %v3234_v32  ;;  %v4614_v42 = vld [vmem:[#allocation8 + $0x1c8] sm:$0xff]  }
 0x1e2   :  { %4478 = vmatpush3.bf16.msra.mxu1 %v4570_v48 }
 0x1e3   :  { %4479 = vmatprep.subr.bf16.mxu1 %v4572_v16  ;;  %v4615_v16 = vld [vmem:[#allocation8 + $0x188] sm:$0xff]  }
 0x1e4   :  { %4458 = vmatpush3.bf16.msra.mxu0 %v4563_v50  ;;  %v520_v50 = vsub.s32 4, %v4903_v3 }
 0x1e5   :  { %4459 = vmatprep.subr.bf16.mxu0 %v4565_v51  ;;  %v4616_v51 = vld [vmem:[#allocation8 + $0x1c0] sm:$0xff]  }
 0x1e6   :  { %4480 = vmatpush3.bf16.msra.mxu1 %v4574_v52 }
 0x1e7   :  { %4481 = vmatprep.subr.bf16.mxu1 %v4576_v33  ;;  %v4617_v33 = vld [vmem:[#allocation8 + $0x180] sm:$0xff]  }
 0x1e8   :  { %4460 = vmatpush3.bf16.msra.mxu0 %v4567_v53  ;;  %v524_v53 = vsub.s32 5, %v4903_v3 }
 0x1e9   :  { %4461 = vmatprep.subr.bf16.mxu0 %v4569_v54 }
 0x1ea   :  { %4482 = vmatpush3.bf16.msra.mxu1 %v4578_v55  ;;  %v521_v55 = vrot.slane %v4906_v15, %v520_v50 }
 0x1eb   :  { %4483 = vmatprep.subr.bf16.mxu1 %v4580_v57 }
 0x1ec   :  { %v4625_v0 = vpop.eup %4624  ;;  %4462 = vmatpush3.bf16.msra.mxu0 %v4571_v59  ;;  %v525_v59 = vrot.slane %v4906_v15, %v524_v53 }
 0x1ed   :  { %v3236_v2 = vadd.bf16 1065369472, %v4625_v0  ;;  %4463 = vmatprep.subr.bf16.mxu0 %v4573_v60 }
 0x1ee   :  { %v4627_v5 = vpop.eup %4626  ;;  %4484 = vmatpush3.bf16.msra.mxu1 %v4581_v61 }
 0x1ef   :  { %v3237_v6 = vadd.bf16 1065369472, %v4627_v5  ;;  %4630 = vrcp.bf16 %v3236_v2  ;;  %4485 = vmatprep.subr.bf16.mxu1 %v4582_v1  ;;  %v4629_v8 = vpop.eup %4628 }
 0x1f0   :  { %4464 = vmatpush3.bf16.msra.mxu0 %v4575_v4  ;;  %v3243_v11 = vmul.bf16 1065369472, %v4629_v8 }
 0x1f1   :  { %4632 = vrcp.bf16 %v3237_v6  ;;  %4465 = vmatprep.subr.bf16.mxu0 %v4577_v45 }
 0x1f2   :  { %4486 = vmatpush3.bf16.msra.mxu1 %v4583_v7 }
 0x1f3   :  { %4487 = vmatprep.subr.bf16.mxu1 %v4584_v58 }
 0x1f4   :  { %4466 = vmatpush3.bf16.msra.mxu0 %v4579_v63 }
 0x1f5   :  { %4495 = vmatprep.subr.bf16.mxu0 %v4586_v46 }
 0x1f6   :  { %4488 = vmatpush3.bf16.msra.mxu1 %v4585_v10 }
 0x1f7   :  { %3810 = vmatmul.mubr.bf16.vlgmr.msra.gmra.mxu0 %v3243_v11  ;;  %4517 = vmatprep.subr.bf16.mxu1 %v4602_v30 }
 0x1f8   :  { %4496 = vmatpush3.bf16.msra.mxu0 %v4587_v9 }
 0x1f9   :  { %4497 = vmatprep.subr.bf16.mxu0 %v4588_v12 }
 0x1fc   :  { %4498 = vmatpush3.bf16.msra.mxu0 %v4589_v13 }
 0x1fd   :  { %v4631_v23 = vpop.eup %4630  ;;  %4499 = vmatprep.subr.bf16.mxu0 %v4590_v21 }
 0x1fe   :  { %v3247_v19 = vmul.bf16 1065369472, %v4631_v23 }
 0x1ff   :  { %v4633_v18 = vpop.eup %4632 }
 0x200   :  { %v3249_v56 = vmul.bf16 1065369472, %v4633_v18  ;;  %4500 = vmatpush3.bf16.msra.mxu0 %v4591_v14 }
 0x201   :  { %4501 = vmatprep.subr.bf16.mxu0 %v4592_v17 }
 0x202   :  { %3850 = vmatprep.mubr.bf16.mxu1 %v3249_v56 }
 0x203   :  { %3851 = vmatmul.mubr.bf16.vlgmr.msra.gmra.mxu1 %v3247_v19 }
 0x204   :  { %4502 = vmatpush3.bf16.msra.mxu0 %v4593_v22  ;;  %4518 = vmatpush3.bf16.msra.mxu1 %v4603_v20 }
 0x205   :  { %4503 = vmatprep.subr.bf16.mxu0 %v4594_v40  ;;  %4519 = vmatprep.subr.bf16.mxu1 %v4604_v62 }
 0x208   :  { %4504 = vmatpush3.bf16.msra.mxu0 %v4595_v25  ;;  %4520 = vmatpush3.bf16.msra.mxu1 %v4605_v34 }
 0x209   :  { %4505 = vmatprep.subr.bf16.mxu0 %v4596_v26  ;;  %4521 = vmatprep.subr.bf16.mxu1 %v4606_v35  ;;  %v528_v35 = vsub.s32 6, %v4903_v3 }
 0x20c   :  { %4506 = vmatpush3.bf16.msra.mxu0 %v4597_v27  ;;  %4522 = vmatpush3.bf16.msra.mxu1 %v4607_v36 }
 0x20d   :  { %4507 = vmatprep.subr.bf16.mxu0 %v4598_v28  ;;  %4523 = vmatprep.subr.bf16.mxu1 %v4608_v37  ;;  %v532_v37 = vsub.s32 7, %v4903_v3 }
 0x20f   :  { %v2884_v48 = vpop.f32.mrf.mxu0 }
 0x210   :  { %4508 = vmatpush3.bf16.msra.mxu0 %v4599_v31  ;;  %4524 = vmatpush3.bf16.msra.mxu1 %v4609_v38  ;;  %v2885_v61 = vadd.f32 %v2884_v48, %v521_v55 }
 0x211   :  { %4509 = vmatprep.subr.bf16.mxu0 %v4600_v29  ;;  %4525 = vmatprep.subr.bf16.mxu1 %v4610_v39  ;;  %v2927_v49 = vpop.f32.mrf.mxu1  ;;  %v2886_v52 = vpop.f32.mrf.mxu0 }
 0x212   :  { %v2887_v1 = vadd.f32 %v2886_v52, %v525_v59  ;;  %v2928_v45 = vadd.f32 %v2927_v49, %v2885_v61 }
 0x213   :  { %v2929_v47 = vpop.f32.mrf.mxu1  ;;  %v2888_v57 = vpop.f32.mrf.mxu0 }
 0x214   :  { %4510 = vmatpush3.bf16.msra.mxu0 %v4601_v24  ;;  %4526 = vmatpush3.bf16.msra.mxu1 %v4611_v41  ;;  %v2889_v2 = vadd.f32 %v2888_v57, %v521_v55  ;;  %v2930_v58 = vadd.f32 %v2929_v47, %v2887_v1  ;;  %v529_v41 = vrot.slane %v4906_v15, %v528_v35 }
 0x215   :  { %4527 = vmatprep.subr.bf16.mxu1 %v4612_v43  ;;  %v2931_v32 = vpop.f32.mrf.mxu1  ;;  %v2890_v0 = vpop.f32.mrf.mxu0  ;;  %v533_v43 = vrot.slane %v4906_v15, %v532_v37 }
 0x216   :  { %v2891_v6 = vadd.f32 %v2890_v0, %v525_v59  ;;  %v2932_v63 = vadd.f32 %v2931_v32, %v2889_v2 }
 0x217   :  { %v2933_v54 = vpop.f32.mrf.mxu1 }
 0x218   :  { %4528 = vmatpush3.bf16.msra.mxu1 %v4613_v44  ;;  %v2934_v9 = vadd.f32 %v2933_v54, %v2891_v6 }
 0x219   :  { %4529 = vmatprep.subr.bf16.mxu1 %v4614_v42  ;;  %v3013_v60 = vpop.f32.mrf.mxu1 }
 0x21b   :  { %v3015_v4 = vpop.f32.mrf.mxu1 }
 0x21c   :  { %4530 = vmatpush3.bf16.msra.mxu1 %v4615_v16 }
 0x21d   :  { %4531 = vmatprep.subr.bf16.mxu1 %v4616_v51  ;;  %v3017_v8 = vpop.f32.mrf.mxu1 }
 0x21f   :  { %v3019_v17 = vpop.f32.mrf.mxu1 }
 0x220   :  { %4532 = vmatpush3.bf16.msra.mxu1 %v4617_v33 }
 0x24f   :  { %v2970_v5 = vpop.f32.mrf.mxu0 }
 0x250   :  { %v2971_v46 = vadd.f32 %v2970_v5, %v2928_v45 }
 0x251   :  { %v2972_v7 = vpop.f32.mrf.mxu0 }
 0x252   :  { %v2973_v11 = vadd.f32 %v2972_v7, %v2930_v58  ;;  %v3014_v21 = vadd.f32 %v3013_v60, %v2971_v46 }
 0x253   :  { %v2974_v10 = vpop.f32.mrf.mxu0 }
 0x254   :  { %v2975_v12 = vadd.f32 %v2974_v10, %v2932_v63  ;;  %v3016_v18 = vadd.f32 %v3015_v4, %v2973_v11 }
 0x255   :  { %v2976_v13 = vpop.f32.mrf.mxu0 }
 0x256   :  { %v3018_v14 = vadd.f32 %v3017_v8, %v2975_v12  ;;  %v2977_v23 = vadd.f32 %v2976_v13, %v2934_v9 }
 0x258   :  { %v3198_v56 = vpack.c.bf16 %v3018_v14, %v3014_v21  ;;  %v3020_v19 = vadd.f32 %v3019_v17, %v2977_v23 }
 0x259   :  { %v3056_v62 = vpop.f32.mrf.mxu1 }
 0x25a   :  { %v4382_v22 = vmul.bf16 3216621497, %v3198_v56  ;;  %v3199_v40 = vpack.c.bf16 %v3020_v19, %v3016_v18  ;;  %v3057_v42 = vadd.f32 %v3056_v62, %v529_v41 }
 0x25b   :  { %v3058_v34 = vpop.f32.mrf.mxu1 }
 0x25c   :  { %4634 = vpow.bf16 %v4382_v22  ;;  %v4383_v25 = vmul.bf16 3216621497, %v3199_v40  ;;  %v3059_v32 = vadd.f32 %v3058_v34, %v533_v43 }
 0x25d   :  { %v3060_v39 = vpop.f32.mrf.mxu1 }
 0x25e   :  { %4636 = vpow.bf16 %v4383_v25  ;;  %v3061_v50 = vadd.f32 %v3060_v39, %v529_v41 }
 0x25f   :  { %v3062_v47 = vpop.f32.mrf.mxu1 }
 0x260   :  { %v3063_v53 = vadd.f32 %v3062_v47, %v533_v43 }
 0x26a   :  { %v4635_v26 = vpop.eup %4634 }
 0x26b   :  { %v3238_v27 = vadd.bf16 1065369472, %v4635_v26 }
 0x26c   :  { %v4637_v28 = vpop.eup %4636 }
 0x26d   :  { %v3239_v31 = vadd.bf16 1065369472, %v4637_v28  ;;  %4638 = vrcp.bf16 %v3238_v27  ;;  %v4386_v28 = vld [vmem:[#allocation10] ss:$0 sm:$0xff] }
 0x26f   :  { %4640 = vrcp.bf16 %v3239_v31 }
 0x27b   :  { %v4639_v29 = vpop.eup %4638 }
 0x27c   :  { %v3251_v20 = vmul.bf16 1065369472, %v4639_v29 }
 0x27d   :  { %v4641_v24 = vpop.eup %4640 }
 0x27e   :  { %v3253_v30 = vmul.bf16 1065369472, %v4641_v24 }
 0x280   :  { %3891 = vmatprep.mubr.bf16.mxu0 %v3253_v30 }
 0x281   :  { %3892 = vmatmul.mubr.bf16.vlgmr.msra.gmra.mxu0 %v3251_v20 }
 0x28f   :  { %v3099_v36 = vpop.f32.mrf.mxu0 }
 0x290   :  { %v3100_v51 = vadd.f32 %v3099_v36, %v3057_v42 }
 0x291   :  { %v3101_v38 = vpop.f32.mrf.mxu0 }
 0x292   :  { %v3102_v54 = vadd.f32 %v3101_v38, %v3059_v32 }
 0x293   :  { %v3103_v49 = vpop.f32.mrf.mxu0 }
 0x294   :  { %v3104_v3 = vadd.f32 %v3103_v49, %v3061_v50 }
 0x295   :  { %v3105_v44 = vpop.f32.mrf.mxu0 }
 0x296   :  { %v3106_v60 = vadd.f32 %v3105_v44, %v3063_v53 }
 0x297   :  { %v3185_v48 = vpop.f32.mrf.mxu0 }
 0x299   :  { %v3142_v16 = vpop.f32.mrf.mxu1  ;;  %v3187_v52 = vpop.f32.mrf.mxu0 }
 0x29a   :  { %v3143_v55 = vadd.f32 %v3142_v16, %v3100_v51 }
 0x29b   :  { %v3144_v33 = vpop.f32.mrf.mxu1  ;;  %v3189_v57 = vpop.f32.mrf.mxu0 }
 0x29c   :  { %v3145_v61 = vadd.f32 %v3144_v33, %v3102_v54  ;;  %v3186_v2 = vadd.f32 %v3185_v48, %v3143_v55 }
 0x29d   :  { %v3146_v59 = vpop.f32.mrf.mxu1  ;;  %v3191_v1 = vpop.f32.mrf.mxu0 }
 0x29e   :  { %v3147_v0 = vadd.f32 %v3146_v59, %v3104_v3  ;;  %v3188_v45 = vadd.f32 %v3187_v52, %v3145_v61 }
 0x29f   :  { %v3148_v15 = vpop.f32.mrf.mxu1 }
 0x2a0   :  { %v3190_v4 = vadd.f32 %v3189_v57, %v3147_v0  ;;  %v3149_v5 = vadd.f32 %v3148_v15, %v3106_v60 }
 0x2a2   :  { %v3200_v6 = vpack.c.bf16 %v3190_v4, %v3186_v2  ;;  %v3192_v7 = vadd.f32 %v3191_v1, %v3149_v5 }
 0x2a4   :  { %v4384_v58 = vmul.bf16 3216621497, %v3200_v6  ;;  %v3201_v63 = vpack.c.bf16 %v3192_v7, %v3188_v45 }
 0x2a6   :  { %4642 = vpow.bf16 %v4384_v58  ;;  %v4385_v46 = vmul.bf16 3216621497, %v3201_v63 }
 0x2a8   :  { %4644 = vpow.bf16 %v4385_v46 }
 0x2b4   :  { %v4643_v8 = vpop.eup %4642 }
 0x2b5   :  { %v3240_v10 = vadd.bf16 1065369472, %v4643_v8 }
 0x2b6   :  { %v4645_v9 = vpop.eup %4644 }
 0x2b7   :  { %v3241_v11 = vadd.bf16 1065369472, %v4645_v9  ;;  %4646 = vrcp.bf16 %v3240_v10  ;;  %v4467_v23 = vpop.f32.mrf.mxu0 }
 0x2b9   :  { %4648 = vrcp.bf16 %v3241_v11  ;;  %v4468_v17 = vpop.f32.mrf.mxu0 }
 0x2ba   :  { %v4469_v27 = vadd.f32 %v4468_v17, %v4467_v23 }
 0x2bb   :  { %v4470_v18 = vpop.f32.mrf.mxu0 }
 0x2bc   :  { %v3812_v30 = vadd.f32 %v4469_v27, %v4386_v28 }
 0x2bd   :  { %v4471_v56 = vpop.f32.mrf.mxu0 }
 0x2be   :  { %v4472_v20 = vadd.f32 %v4471_v56, %v4470_v18 }
 0x2c0   :  { %v3815_v39 = vadd.f32 %v4472_v20, %v4386_v28 }
 0x2c3   :  { %v4489_v19 = vpop.f32.mrf.mxu1 }
 0x2c5   :  { %v4647_v12 = vpop.eup %4646  ;;  %v4490_v40 = vpop.f32.mrf.mxu1 }
 0x2c6   :  { %v3255_v14 = vmul.bf16 1065369472, %v4647_v12  ;;  %v4491_v29 = vadd.f32 %v4490_v40, %v4489_v19 }
 0x2c7   :  { %v4649_v13 = vpop.eup %4648  ;;  %v4492_v26 = vpop.f32.mrf.mxu1 }
 0x2c8   :  { %v3257_v21 = vmul.bf16 1065369472, %v4649_v13  ;;  %v3853_v36 = vadd.f32 %v4491_v29, %v3812_v30 }
 0x2c9   :  { %v4493_v24 = vpop.f32.mrf.mxu1 }
 0x2ca   :  { %3932 = vmatprep.mubr.bf16.mxu1 %v3257_v21  ;;  %v4494_v37 = vadd.f32 %v4493_v24, %v4492_v26 }
 0x2cb   :  { %3933 = vmatmul.mubr.bf16.vlgmr.msra.gmra.mxu1 %v3255_v14 }
 0x2cc   :  { %v3856_v47 = vadd.f32 %v4494_v37, %v3815_v39 }
 0x341   :  { %v4511_v22 = vpop.f32.mrf.mxu0 }
 0x343   :  { %v4512_v25 = vpop.f32.mrf.mxu0 }
 0x344   :  { %v4513_v62 = vadd.f32 %v4512_v25, %v4511_v22 }
 0x345   :  { %v4514_v31 = vpop.f32.mrf.mxu0 }
 0x346   :  { %v3894_v41 = vadd.f32 %v4513_v62, %v3853_v36 }
 0x347   :  { %v4515_v34 = vpop.f32.mrf.mxu0 }
 0x348   :  { %v4516_v49 = vadd.f32 %v4515_v34, %v4514_v31 }
 0x34a   :  { %v3897_v16 = vadd.f32 %v4516_v49, %v3856_v47 }
 0x38b   :  { %v4533_v35 = vpop.f32.mrf.mxu1 }
 0x38d   :  { %v4534_v38 = vpop.f32.mrf.mxu1 }
 0x38e   :  { %v4535_v43 = vadd.f32 %v4534_v38, %v4533_v35 }
 0x38f   :  { %v4536_v44 = vpop.f32.mrf.mxu1 }
 0x390   :  { %v3935_v42 = vadd.f32 %v4535_v43, %v3894_v41 }
 0x391   :  { %v4537_v48 = vpop.f32.mrf.mxu1 }
 0x392   :  { %v4538_v32 = vadd.f32 %v4537_v48, %v4536_v44  ;;  %3941 = vmax.xlane.f32.xlu0 %v3935_v42 }
 0x394   :  { %v3938_v50 = vadd.f32 %v4538_v32, %v3897_v16 }
 0x396   :  { %3943 = vmax.xlane.f32.xlu0 %v3938_v50 }
 0x41b   :  { %v3942_v51 = vpop.xlane.xlu0 %3941 }
 0x41c   :  { %v3945_v52 = vsub.f32 %v3935_v42, %v3942_v51 }
 0x41e   :  { %v3947_v33 = vmul.f32 1.442695, %v3945_v52 }
 0x41f   :  { %v3944_v53 = vpop.xlane.xlu0 %3943 }
 0x420   :  { %v3946_v54 = vsub.f32 %v3938_v50, %v3944_v53  ;;  %4650 = vpow2.f32 %v3947_v33 }
 0x422   :  { %v3949_v3 = vmul.f32 1.442695, %v3946_v54 }
 0x424   :  { %4652 = vpow2.f32 %v3949_v3 }
 0x42d   :  { %v4651_v55 = vpop.eup %4650 }
 0x42e   :  { %3951 = vadd.xlane.f32.xlu1 %v4651_v55 }
 0x431   :  { %v4653_v57 = vpop.eup %4652 }
 0x432   :  { %3953 = vadd.xlane.f32.xlu1 %v4653_v57 }
 0x4b7   :  { %v3952_v59 = vpop.xlane.xlu1 %3951 }
 0x4b8   :  { %4654 = vlog2.f32 %v3952_v59 }
 0x4bb   :  { %v3954_v60 = vpop.xlane.xlu1 %3953 }
 0x4bc   :  { %4656 = vlog2.f32 %v3954_v60 }
 0x4c5   :  { %v4655_v61 = vpop.eup %4654 }
 0x4c6   :  { %v3956_v0 = vmul.f32 0.6931472, %v4655_v61 }
 0x4c8   :  { %v3959_v15 = vsub.f32 %v3945_v52, %v3956_v0 }
 0x4c9   :  { %v4657_v1 = vpop.eup %4656 }
 0x4ca   :  { %3961 = vst [vmem:[#allocation11] sm:$0xff] %v3959_v15  ;;  %v3958_v2 = vmul.f32 0.6931472, %v4657_v1 }
 0x4cc   :  { %v3960_v4 = vsub.f32 %v3946_v54, %v3958_v2 }
 0x4ce   :  { %3962 = vst [vmem:[#allocation11 + $0x8] sm:$0xff] %v3960_v4 }
 0x4cf   :  { %4769 = shalt.err (!%p4766_p1)
}
 0x4d0   :  { %s4799_s23 = smov 128   ;;  %s4800_s24 = smov 8  }
 0x4d1   :  { %3974 = dma.vmem_to_hbm [thread:$0]  %s3969_s4, 256, %s4954_s5, [#allocation4], %s4799_s23, %s4799_s23, %s4800_s24  }
 0x4d2   :  { %4784 = dma.done.wait [#allocation4], 256  }
 0x4d3   :  { %4785 = vsyncadd [#allocation4], 4294967040 }
 0x4d4   :  { %3978 = vsyncpa [#allocation3], 1 }
 0x4d5   :  { %3979 = vsyncpa [#allocation6], 1 }
 0x4d6   :  { %3980 = vsyncpa [#allocation9], 1 }
 0x4d7   :  { %3981 = vsyncpa [#allocation4], 1 }

</bundles_post_ra>
